<compile_context>
chip_gen: v7x
topology: tpu7x:2x2x1
jax: 0.10.0
libtpu: 0.0.40
codegen_flags: <defaults>
</compile_context>

<pallas_src>
import functools
import math

import numpy as np
import jax
import jax.numpy as jnp
from jax.experimental import pallas as pl
from jax.experimental.pallas import tpu as pltpu


# ----------------------------------------------------------------------------
# In-kernel helpers
# ----------------------------------------------------------------------------
def _add_layernorm(x, y, gamma, beta, eps):
    """LayerNorm(x + y) over last dim.  gamma/beta are (1, D)."""
    z = x + y
    mu = jnp.mean(z, axis=-1, keepdims=True)
    var = jnp.mean(jnp.square(z - mu), axis=-1, keepdims=True)
    return (z - mu) * jax.lax.rsqrt(var + eps) * gamma + beta


def _attention_heads(q_all, k_all, v_all, mask, probs_ref, *,
                     n_head, d_head, scale, cdt):
    """All heads of one batch element.  q_all/k_all/v_all: (S*, H*dh) f32.
    mask: (Sq, Sk) bool, True == masked.  Writes probs_ref[0, h]; returns (Sq, H*dh) ctx."""
    ctx_parts = []
    for h in range(n_head):                      # static unroll (H is small)
        lo = h * d_head
        hi = lo + d_head
        qh = q_all[:, lo:hi]
        kh = k_all[:, lo:hi]
        vh = v_all[:, lo:hi]
        # QK^T without an explicit transpose: contract both operands on their last dim.
        s = jax.lax.dot_general(
            qh.astype(cdt), kh.astype(cdt),
            dimension_numbers=(((1,), (1,)), ((), ())),
            preferred_element_type=jnp.float32) * scale
        s = jnp.where(mask, jnp.float32(-1e9), s)          # masked_fill_
        s = s - jnp.max(s, axis=-1, keepdims=True)
        e = jnp.exp(s)
        p = e * pl.reciprocal(jnp.sum(e, axis=-1, keepdims=True), approx=True)
        probs_ref[0, h] = p
        ctx_parts.append(
            jnp.dot(p.astype(cdt), vh.astype(cdt),
                    preferred_element_type=jnp.float32))
    return jnp.concatenate(ctx_parts, axis=-1)             # (Sq, H*dh)


# ----------------------------------------------------------------------------
# Fused MHA (+ residual + LayerNorm) kernels — one batch element per grid step
# ----------------------------------------------------------------------------
def _mha_self_kernel(x_ref, wqkv_ref, bqkv_ref, wo_ref, bo_ref, m_ref,
                     g_ref, b_ref, out_ref, probs_ref,
                     *, n_head, d_head, scale, eps, cdt):
    hd = n_head * d_head
    x = x_ref[0]                                           # (S, D) f32
    # Fused Q|K|V projection: single MXU matmul with 3x the N dimension.
    qkv = jnp.dot(x.astype(cdt), wqkv_ref[...].astype(cdt),
                  preferred_element_type=jnp.float32) + bqkv_ref[...]
    mask = m_ref[0] != 0                                   # (S, S) bool, reused by all heads
    ctx = _attention_heads(qkv[:, :hd], qkv[:, hd:2 * hd], qkv[:, 2 * hd:],
                           mask, probs_ref, n_head=n_head, d_head=d_head,
                           scale=scale, cdt=cdt)
    att = jnp.dot(ctx.astype(cdt), wo_ref[...].astype(cdt),
                  preferred_element_type=jnp.float32) + bo_ref[...]
    out_ref[0] = _add_layernorm(x, att, g_ref[...], b_ref[...], eps)


def _mha_cross_kernel(xq_ref, xkv_ref, wqkv_ref, bqkv_ref, wo_ref, bo_ref, m_ref,
                      g_ref, b_ref, out_ref, probs_ref,
                      *, n_head, d_head, scale, eps, cdt):
    hd = n_head * d_head
    xq = xq_ref[0]                                         # (Sq, D)
    xkv = xkv_ref[0]                                       # (Sk, D)
    wqkv = wqkv_ref[...]
    bqkv = bqkv_ref[...]
    q_all = jnp.dot(xq.astype(cdt), wqkv[:, :hd].astype(cdt),
                    preferred_element_type=jnp.float32) + bqkv[:, :hd]
    kv = jnp.dot(xkv.astype(cdt), wqkv[:, hd:].astype(cdt),   # fused K|V projection
                 preferred_element_type=jnp.float32) + bqkv[:, hd:]
    mask = m_ref[0] != 0                                   # (Sq, Sk) bool
    ctx = _attention_heads(q_all, kv[:, :hd], kv[:, hd:],
                           mask, probs_ref, n_head=n_head, d_head=d_head,
                           scale=scale, cdt=cdt)
    att = jnp.dot(ctx.astype(cdt), wo_ref[...].astype(cdt),
                  preferred_element_type=jnp.float32) + bo_ref[...]
    out_ref[0] = _add_layernorm(xq, att, g_ref[...], b_ref[...], eps)


def mha_self_ln(p, x, mask_i8, gamma, beta, cfg):
    """Fused: LN(x + MHA(x, x, mask)).  Returns (out (B,S,D), probs (B,H,S,S))."""
    B, S, D = x.shape
    H, dh = cfg["n_head"], cfg["d_head"]
    hd = H * dh
    cdt = cfg.get("mxu_dtype", jnp.float32)
    kernel = functools.partial(_mha_self_kernel, n_head=H, d_head=dh,
                               scale=1.0 / math.sqrt(dh),
                               eps=cfg["layer_norm_epsilon"], cdt=cdt)
    out, probs = pl.pallas_call(
        kernel,
        out_shape=(jax.ShapeDtypeStruct((B, S, D), jnp.float32),
                   jax.ShapeDtypeStruct((B, H, S, S), jnp.float32)),
        grid=(B,),
        in_specs=[
            pl.BlockSpec((1, S, D), lambda b: (b, 0, 0)),      # x (query == key/value == residual)
            pl.BlockSpec((D, 3 * hd), lambda b: (0, 0)),       # Wq|Wk|Wv fused
            pl.BlockSpec((1, 3 * hd), lambda b: (0, 0)),
            pl.BlockSpec((hd, D), lambda b: (0, 0)),           # Wo
            pl.BlockSpec((1, D), lambda b: (0, 0)),
            pl.BlockSpec((1, S, S), lambda b: (b, 0, 0)),      # int8 mask, shared by all heads
            pl.BlockSpec((1, D), lambda b: (0, 0)),            # LN gamma
            pl.BlockSpec((1, D), lambda b: (0, 0)),            # LN beta
        ],
        out_specs=(pl.BlockSpec((1, S, D), lambda b: (b, 0, 0)),
                   pl.BlockSpec((1, H, S, S), lambda b: (b, 0, 0, 0))),
        compiler_params=pltpu.CompilerParams(
            dimension_semantics=("parallel",),
            vmem_limit_bytes=32 * 1024 * 1024),
    )(x, p["wqkv"], p["bqkv"].reshape(1, 3 * hd), p["wo"], p["bo"].reshape(1, D),
      mask_i8, gamma.reshape(1, D), beta.reshape(1, D))
    return out, probs


def mha_cross_ln(p, xq, xkv, mask_i8, gamma, beta, cfg):
    """Fused: LN(xq + MHA(xq, xkv, mask)).  Returns (out (B,Sq,D), probs (B,H,Sq,Sk))."""
    B, Sq, D = xq.shape
    Sk = xkv.shape[1]
    H, dh = cfg["n_head"], cfg["d_head"]
    hd = H * dh
    cdt = cfg.get("mxu_dtype", jnp.float32)
    kernel = functools.partial(_mha_cross_kernel, n_head=H, d_head=dh,
                               scale=1.0 / math.sqrt(dh),
                               eps=cfg["layer_norm_epsilon"], cdt=cdt)
    out, probs = pl.pallas_call(
        kernel,
        out_shape=(jax.ShapeDtypeStruct((B, Sq, D), jnp.float32),
                   jax.ShapeDtypeStruct((B, H, Sq, Sk), jnp.float32)),
        grid=(B,),
        in_specs=[
            pl.BlockSpec((1, Sq, D), lambda b: (b, 0, 0)),     # query / residual
            pl.BlockSpec((1, Sk, D), lambda b: (b, 0, 0)),     # key/value source (encoder out)
            pl.BlockSpec((D, 3 * hd), lambda b: (0, 0)),
            pl.BlockSpec((1, 3 * hd), lambda b: (0, 0)),
            pl.BlockSpec((hd, D), lambda b: (0, 0)),
            pl.BlockSpec((1, D), lambda b: (0, 0)),
            pl.BlockSpec((1, Sq, Sk), lambda b: (b, 0, 0)),
            pl.BlockSpec((1, D), lambda b: (0, 0)),
            pl.BlockSpec((1, D), lambda b: (0, 0)),
        ],
        out_specs=(pl.BlockSpec((1, Sq, D), lambda b: (b, 0, 0)),
                   pl.BlockSpec((1, H, Sq, Sk), lambda b: (b, 0, 0, 0))),
        compiler_params=pltpu.CompilerParams(
            dimension_semantics=("parallel",),
            vmem_limit_bytes=32 * 1024 * 1024),
    )(xq, xkv, p["wqkv"], p["bqkv"].reshape(1, 3 * hd), p["wo"], p["bo"].reshape(1, D),
      mask_i8, gamma.reshape(1, D), beta.reshape(1, D))
    return out, probs


# ----------------------------------------------------------------------------
# Fused position-wise FFN (+ residual + LayerNorm), row-tiled
# ----------------------------------------------------------------------------
def _ffn_ln_kernel(x_ref, w1_ref, b1_ref, w2_ref, b2_ref, g_ref, be_ref, o_ref,
                   *, eps, cdt):
    x = x_ref[...]                                          # (TM, D) f32
    h = jnp.dot(x.astype(cdt), w1_ref[...].astype(cdt),
                preferred_element_type=jnp.float32) + b1_ref[...]
    # TODO(synk): PyTorch F.gelu default is exact (erf-based); tanh approximation
    # used here for guaranteed Mosaic lowering.
    h = jax.nn.gelu(h, approximate=True)
    y = jnp.dot(h.astype(cdt), w2_ref[...].astype(cdt),
                preferred_element_type=jnp.float32) + b2_ref[...]
    o_ref[...] = _add_layernorm(x, y, g_ref[...], be_ref[...], eps)


def _row_tile(n, target=512):
    """Largest row-tile <= target that divides n (multiple of 8 when possible)."""
    if n <= target:
        return n
    start = (min(target, n) // 8) * 8
    for tm in range(start, 7, -8):
        if n % tm == 0:
            return tm
    return n


def ffn_ln(x, p, gamma, beta, cfg):
    """Fused: LN(x + W2 @ gelu(W1 @ x + b1) + b2).  x: (B, S, D)."""
    B, S, D = x.shape
    n = B * S
    dff = p["w1"].shape[1]
    tm = _row_tile(n)
    cdt = cfg.get("mxu_dtype", jnp.float32)
    kernel = functools.partial(_ffn_ln_kernel, eps=cfg["layer_norm_epsilon"], cdt=cdt)
    out = pl.pallas_call(
        kernel,
        out_shape=jax.ShapeDtypeStruct((n, D), jnp.float32),
        grid=(n // tm,),
        in_specs=[
            pl.BlockSpec((tm, D), lambda i: (i, 0)),
            pl.BlockSpec((D, dff), lambda i: (0, 0)),
            pl.BlockSpec((1, dff), lambda i: (0, 0)),
            pl.BlockSpec((dff, D), lambda i: (0, 0)),
            pl.BlockSpec((1, D), lambda i: (0, 0)),
            pl.BlockSpec((1, D), lambda i: (0, 0)),
            pl.BlockSpec((1, D), lambda i: (0, 0)),
        ],
        out_specs=pl.BlockSpec((tm, D), lambda i: (i, 0)),
        compiler_params=pltpu.CompilerParams(
            dimension_semantics=("parallel",),
            vmem_limit_bytes=32 * 1024 * 1024),
    )(x.reshape(n, D), p["w1"], p["b1"].reshape(1, dff), p["w2"],
      p["b2"].reshape(1, D), gamma.reshape(1, D), beta.reshape(1, D))
    return out.reshape(B, S, D)


# ----------------------------------------------------------------------------
# Model glue (masks, embeddings, layer composition) in plain JAX
# ----------------------------------------------------------------------------
def get_sinusoid_table(n_seq, d_hidn):
    pos = np.arange(n_seq, dtype=np.float64)[:, None]
    i = np.arange(d_hidn, dtype=np.float64)[None, :]
    angle = pos / np.power(10000.0, 2.0 * (i // 2) / d_hidn)
    table = np.zeros((n_seq, d_hidn), dtype=np.float64)
    table[:, 0::2] = np.sin(angle[:, 0::2])
    table[:, 1::2] = np.cos(angle[:, 1::2])
    return jnp.asarray(table, dtype=jnp.float32)


def attn_pad_mask(seq_q, seq_k, i_pad):
    b, sq = seq_q.shape
    sk = seq_k.shape[1]
    pad = (seq_k == i_pad)[:, None, :]
    return jnp.broadcast_to(pad, (b, sq, sk))


def attn_subsequent_mask(seq):
    b, s = seq.shape
    sub = jnp.triu(jnp.ones((s, s), dtype=jnp.bool_), k=1)
    return jnp.broadcast_to(sub[None], (b, s, s))


def encoder_layer(p, x, pad_mask, cfg):
    x, att_prob = mha_self_ln(p["attn"], x, pad_mask, p["ln1"]["g"], p["ln1"]["b"], cfg)
    x = ffn_ln(x, p["ffn"], p["ln2"]["g"], p["ln2"]["b"], cfg)
    return x, att_prob


def decoder_layer(p, x, enc_out, self_mask, cross_mask, cfg):
    x, sa_prob = mha_self_ln(p["self"], x, self_mask, p["ln1"]["g"], p["ln1"]["b"], cfg)
    x, ca_prob = mha_cross_ln(p["cross"], x, enc_out, cross_mask,
                              p["ln2"]["g"], p["ln2"]["b"], cfg)
    x = ffn_ln(x, p["ffn"], p["ln3"]["g"], p["ln3"]["b"], cfg)
    return x, sa_prob, ca_prob


def encoder(params, cfg, enc_inputs):
    B, S = enc_inputs.shape
    positions = (jnp.arange(S, dtype=jnp.int32)[None, :] + 1) * (
        enc_inputs != cfg["i_pad"]).astype(jnp.int32)
    x = jnp.take(params["enc_emb"], enc_inputs, axis=0) + jnp.take(
        params["enc_pos"], positions, axis=0)
    pad_mask = attn_pad_mask(enc_inputs, enc_inputs, cfg["i_pad"]).astype(jnp.int8)
    attn_probs = []
    for lp in params["enc_layers"]:
        x, prob = encoder_layer(lp, x, pad_mask, cfg)
        attn_probs.append(prob)
    return x, attn_probs


def decoder(params, cfg, dec_inputs, enc_inputs, enc_outputs):
    B, S = dec_inputs.shape
    positions = (jnp.arange(S, dtype=jnp.int32)[None, :] + 1) * (
        dec_inputs != cfg["i_pad"]).astype(jnp.int32)
    x = jnp.take(params["dec_emb"], dec_inputs, axis=0) + jnp.take(
        params["dec_pos"], positions, axis=0)
    self_pad = attn_pad_mask(dec_inputs, dec_inputs, cfg["i_pad"])
    self_sub = attn_subsequent_mask(dec_inputs)
    self_mask = jnp.logical_or(self_pad, self_sub).astype(jnp.int8)
    cross_mask = attn_pad_mask(dec_inputs, enc_inputs, cfg["i_pad"]).astype(jnp.int8)
    self_probs, cross_probs = [], []
    for lp in params["dec_layers"]:
        x, sp, cp = decoder_layer(lp, x, enc_outputs, self_mask, cross_mask, cfg)
        self_probs.append(sp)
        cross_probs.append(cp)
    return x, self_probs, cross_probs


def transformer_forward(params, cfg, enc_inputs, dec_inputs):
    enc_outputs, enc_self_attn_probs = encoder(params, cfg, enc_inputs)
    dec_outputs, dec_self_attn_probs, dec_enc_attn_probs = decoder(
        params, cfg, dec_inputs, enc_inputs, enc_outputs)
    return dec_outputs, enc_self_attn_probs, dec_self_attn_probs, dec_enc_attn_probs


# ----------------------------------------------------------------------------
# Deterministic parameter init (Q|K|V weights stored fused)
# ----------------------------------------------------------------------------
def init_params(key, cfg):
    d, H, dh, dff = cfg["d_hidn"], cfg["n_head"], cfg["d_head"], cfg["d_ff"]
    hd = H * dh
    keys = iter(jax.random.split(key, 512))

    def mha():
        return {
            "wqkv": 0.02 * jax.random.normal(next(keys), (d, 3 * hd), jnp.float32),
            "bqkv": jnp.zeros((3 * hd,), jnp.float32),
            "wo": 0.02 * jax.random.normal(next(keys), (hd, d), jnp.float32),
            "bo": jnp.zeros((d,), jnp.float32),
        }

    def ln():
        return {"g": jnp.ones((d,), jnp.float32), "b": jnp.zeros((d,), jnp.float32)}

    def ffn():
        return {
            "w1": 0.02 * jax.random.normal(next(keys), (d, dff), jnp.float32),
            "b1": jnp.zeros((dff,), jnp.float32),
            "w2": 0.02 * jax.random.normal(next(keys), (dff, d), jnp.float32),
            "b2": jnp.zeros((d,), jnp.float32),
        }

    enc_layers = [{"attn": mha(), "ln1": ln(), "ffn": ffn(), "ln2": ln()}
                  for _ in range(cfg["n_layer"])]
    dec_layers = [{"self": mha(), "ln1": ln(), "cross": mha(), "ln2": ln(),
                   "ffn": ffn(), "ln3": ln()}
                  for _ in range(cfg["n_layer"])]
    return {
        "enc_emb": 0.02 * jax.random.normal(next(keys), (cfg["n_enc_vocab"], d), jnp.float32),
        "dec_emb": 0.02 * jax.random.normal(next(keys), (cfg["n_dec_vocab"], d), jnp.float32),
        "enc_pos": get_sinusoid_table(cfg["n_enc_seq"] + 1, d),
        "dec_pos": get_sinusoid_table(cfg["n_dec_seq"] + 1, d),
        "enc_layers": enc_layers,
        "dec_layers": dec_layers,
    }


# ----------------------------------------------------------------------------
if __name__ == "__main__":
    cfg = dict(
        n_enc_vocab=50, n_dec_vocab=50,
        n_enc_seq=8, n_dec_seq=8,
        d_hidn=32, n_head=4, d_head=8, d_ff=64,
        n_layer=2, i_pad=0, layer_norm_epsilon=1e-12,
        # MXU input dtype: jnp.bfloat16 is the fast path on v6e/v7x (f32 accumulation
        # is kept either way); float32 preserves exact parity with the PyTorch reference.
        mxu_dtype=jnp.float32,
    )
    # TODO(synk): dropout layers omitted (eval-mode / p=0 semantics).

    root = jax.random.PRNGKey(0)
    k_params, k_enc, k_dec = jax.random.split(root, 3)
    params = init_params(k_params, cfg)

    enc_inputs = jax.random.randint(k_enc, (2, cfg["n_enc_seq"]), 1,
                                    cfg["n_enc_vocab"], dtype=jnp.int32)
    dec_inputs = jax.random.randint(k_dec, (2, cfg["n_dec_seq"]), 1,
                                    cfg["n_dec_vocab"], dtype=jnp.int32)
    # add some padding so the pad masks are exercised
    enc_inputs = enc_inputs.at[1, 6:].set(cfg["i_pad"])
    dec_inputs = dec_inputs.at[1, 5:].set(cfg["i_pad"])

    fwd = jax.jit(lambda e, d: transformer_forward(params, cfg, e, d))
    outs = fwd(enc_inputs, dec_inputs)
    jax.block_until_ready(outs)

    dec_outputs, enc_probs, dec_self_probs, dec_enc_probs = outs
    assert dec_outputs.shape == (2, cfg["n_dec_seq"], cfg["d_hidn"])
    assert len(enc_probs) == cfg["n_layer"] and enc_probs[0].shape == (2, 4, 8, 8)
    assert len(dec_self_probs) == cfg["n_layer"] and dec_self_probs[0].shape == (2, 4, 8, 8)
    assert len(dec_enc_probs) == cfg["n_layer"] and dec_enc_probs[0].shape == (2, 4, 8, 8)
    assert bool(jnp.all(jnp.isfinite(dec_outputs)))
    print("KERNEL_OK")
</pallas_src>

<mosaic_0001>
module attributes {stable_mosaic.version = 11 : i64} {
  func.func @_ffn_ln_kernel(%arg0: i32, %arg1: memref<16x32xf32, #tpu.memory_space<vmem>>, %arg2: memref<32x64xf32, #tpu.memory_space<vmem>>, %arg3: memref<1x64xf32, #tpu.memory_space<vmem>>, %arg4: memref<64x32xf32, #tpu.memory_space<vmem>>, %arg5: memref<1x32xf32, #tpu.memory_space<vmem>>, %arg6: memref<1x32xf32, #tpu.memory_space<vmem>>, %arg7: memref<1x32xf32, #tpu.memory_space<vmem>>, %arg8: memref<16x32xf32, #tpu.memory_space<vmem>>) attributes {dimension_semantics = [#tpu.dimension_semantics<parallel>], iteration_bounds = array<i64: 1>, scalar_prefetch = 0 : i64, scratch_operands = 0 : i64, tpu.core_type = #tpu.core_type<tc>, window_params = [{transform_indices = @transform_0, window_bounds = array<i64: 16, 32>}, {pipeline_mode = #tpu.pipeline_mode<synchronous>, transform_indices = @transform_1, window_bounds = array<i64: 32, 64>}, {pipeline_mode = #tpu.pipeline_mode<synchronous>, transform_indices = @transform_2, window_bounds = array<i64: 1, 64>}, {pipeline_mode = #tpu.pipeline_mode<synchronous>, transform_indices = @transform_3, window_bounds = array<i64: 64, 32>}, {pipeline_mode = #tpu.pipeline_mode<synchronous>, transform_indices = @transform_4, window_bounds = array<i64: 1, 32>}, {pipeline_mode = #tpu.pipeline_mode<synchronous>, transform_indices = @transform_5, window_bounds = array<i64: 1, 32>}, {pipeline_mode = #tpu.pipeline_mode<synchronous>, transform_indices = @transform_6, window_bounds = array<i64: 1, 32>}, {transform_indices = @transform_7, window_bounds = array<i64: 16, 32>}]} {
    %c0 = arith.constant 0 : index
    %c0_0 = arith.constant 0 : index
    %0 = vector.load %arg1[%c0, %c0_0] : memref<16x32xf32, #tpu.memory_space<vmem>>, vector<16x32xf32>
    %c0_1 = arith.constant 0 : index
    %c0_2 = arith.constant 0 : index
    %1 = vector.load %arg2[%c0_1, %c0_2] : memref<32x64xf32, #tpu.memory_space<vmem>>, vector<32x64xf32>
    %cst = arith.constant dense<0.000000e+00> : vector<16x64xf32>
    %2 = tpu.matmul %0, %1, %cst {dimension_numbers = #tpu.dot_dimension_numbers<[1], [0], [0], [1], [0, 0, 1, 1], [], []>} : vector<16x32xf32>, vector<32x64xf32>, vector<16x64xf32> -> vector<16x64xf32>
    %c0_3 = arith.constant 0 : index
    %c0_4 = arith.constant 0 : index
    %3 = vector.load %arg3[%c0_3, %c0_4] : memref<1x64xf32, #tpu.memory_space<vmem>>, vector<1x64xf32>
    %4 = vector.broadcast %3 : vector<1x64xf32> to vector<16x64xf32>
    %5 = arith.addf %2, %4 : vector<16x64xf32>
    %6 = arith.mulf %5, %5 : vector<16x64xf32>
    %7 = arith.mulf %5, %6 : vector<16x64xf32>
    %cst_5 = arith.constant 4.471500e-02 : f32
    %8 = vector.broadcast %cst_5 : f32 to vector<16x64xf32>
    %9 = arith.mulf %8, %7 : vector<16x64xf32>
    %10 = arith.addf %5, %9 : vector<16x64xf32>
    %cst_6 = arith.constant 0.797884583 : f32
    %11 = vector.broadcast %cst_6 : f32 to vector<16x64xf32>
    %12 = arith.mulf %11, %10 : vector<16x64xf32>
    %13 = math.tanh %12 : vector<16x64xf32>
    %cst_7 = arith.constant 1.000000e+00 : f32
    %14 = vector.broadcast %cst_7 : f32 to vector<16x64xf32>
    %15 = arith.addf %14, %13 : vector<16x64xf32>
    %cst_8 = arith.constant 5.000000e-01 : f32
    %16 = vector.broadcast %cst_8 : f32 to vector<16x64xf32>
    %17 = arith.mulf %16, %15 : vector<16x64xf32>
    %18 = arith.mulf %5, %17 : vector<16x64xf32>
    %c0_9 = arith.constant 0 : index
    %c0_10 = arith.constant 0 : index
    %19 = vector.load %arg4[%c0_9, %c0_10] : memref<64x32xf32, #tpu.memory_space<vmem>>, vector<64x32xf32>
    %cst_11 = arith.constant dense<0.000000e+00> : vector<16x32xf32>
    %20 = tpu.matmul %18, %19, %cst_11 {dimension_numbers = #tpu.dot_dimension_numbers<[1], [0], [0], [1], [0, 0, 1, 1], [], []>} : vector<16x64xf32>, vector<64x32xf32>, vector<16x32xf32> -> vector<16x32xf32>
    %c0_12 = arith.constant 0 : index
    %c0_13 = arith.constant 0 : index
    %21 = vector.load %arg5[%c0_12, %c0_13] : memref<1x32xf32, #tpu.memory_space<vmem>>, vector<1x32xf32>
    %22 = vector.broadcast %21 : vector<1x32xf32> to vector<16x32xf32>
    %23 = arith.addf %20, %22 : vector<16x32xf32>
    %c0_14 = arith.constant 0 : index
    %c0_15 = arith.constant 0 : index
    %24 = vector.load %arg6[%c0_14, %c0_15] : memref<1x32xf32, #tpu.memory_space<vmem>>, vector<1x32xf32>
    %c0_16 = arith.constant 0 : index
    %c0_17 = arith.constant 0 : index
    %25 = vector.load %arg7[%c0_16, %c0_17] : memref<1x32xf32, #tpu.memory_space<vmem>>, vector<1x32xf32>
    %26 = arith.addf %0, %23 : vector<16x32xf32>
    %cst_18 = arith.constant dense<0.000000e+00> : vector<16xf32>
    %27 = vector.multi_reduction <add>, %26, %cst_18 [1] : vector<16x32xf32> to vector<16xf32>
    %28 = vector.shape_cast %27 : vector<16xf32> to vector<16x1xf32>
    %cst_19 = arith.constant 3.200000e+01 : f32
    %29 = vector.broadcast %cst_19 : f32 to vector<16x1xf32>
    %30 = arith.divf %28, %29 : vector<16x1xf32>
    %31 = vector.broadcast %30 : vector<16x1xf32> to vector<16x32xf32>
    %32 = arith.subf %26, %31 : vector<16x32xf32>
    %33 = arith.mulf %32, %32 : vector<16x32xf32>
    %cst_20 = arith.constant dense<0.000000e+00> : vector<16xf32>
    %34 = vector.multi_reduction <add>, %33, %cst_20 [1] : vector<16x32xf32> to vector<16xf32>
    %35 = vector.shape_cast %34 : vector<16xf32> to vector<16x1xf32>
    %cst_21 = arith.constant 3.200000e+01 : f32
    %36 = vector.broadcast %cst_21 : f32 to vector<16x1xf32>
    %37 = arith.divf %35, %36 : vector<16x1xf32>
    %38 = vector.broadcast %30 : vector<16x1xf32> to vector<16x32xf32>
    %39 = arith.subf %26, %38 : vector<16x32xf32>
    %cst_22 = arith.constant 9.99999996E-13 : f32
    %40 = vector.broadcast %cst_22 : f32 to vector<16x1xf32>
    %41 = arith.addf %37, %40 : vector<16x1xf32>
    %42 = math.rsqrt %41 : vector<16x1xf32>
    %43 = vector.broadcast %42 : vector<16x1xf32> to vector<16x32xf32>
    %44 = arith.mulf %39, %43 : vector<16x32xf32>
    %45 = vector.broadcast %24 : vector<1x32xf32> to vector<16x32xf32>
    %46 = arith.mulf %44, %45 : vector<16x32xf32>
    %47 = vector.broadcast %25 : vector<1x32xf32> to vector<16x32xf32>
    %48 = arith.addf %46, %47 : vector<16x32xf32>
    %c0_23 = arith.constant 0 : index
    %c0_24 = arith.constant 0 : index
    %49 = vector.load %arg8[%c0_23, %c0_24] : memref<16x32xf32, #tpu.memory_space<vmem>>, vector<16x32xf32>
    tpu.vector_store %arg8[%c0_23, %c0_24], %48 {strides = array<i32>} : memref<16x32xf32, #tpu.memory_space<vmem>>, vector<16x32xf32>,
    return
  }
  func.func @transform_0(%arg0: i32) -> (i32, i32) {
    %c0_i32 = arith.constant 0 : i32
    %c0_i32_0 = arith.constant 0 : i32
    return %arg0, %c0_i32 : i32, i32
  }
  func.func @transform_1(%arg0: i32) -> (i32, i32) {
    %c0_i32 = arith.constant 0 : i32
    %c0_i32_0 = arith.constant 0 : i32
    %c0_i32_1 = arith.constant 0 : i32
    return %c0_i32, %c0_i32_0 : i32, i32
  }
  func.func @transform_2(%arg0: i32) -> (i32, i32) {
    %c0_i32 = arith.constant 0 : i32
    %c0_i32_0 = arith.constant 0 : i32
    %c0_i32_1 = arith.constant 0 : i32
    return %c0_i32, %c0_i32_0 : i32, i32
  }
  func.func @transform_3(%arg0: i32) -> (i32, i32) {
    %c0_i32 = arith.constant 0 : i32
    %c0_i32_0 = arith.constant 0 : i32
    %c0_i32_1 = arith.constant 0 : i32
    return %c0_i32, %c0_i32_0 : i32, i32
  }
  func.func @transform_4(%arg0: i32) -> (i32, i32) {
    %c0_i32 = arith.constant 0 : i32
    %c0_i32_0 = arith.constant 0 : i32
    %c0_i32_1 = arith.constant 0 : i32
    return %c0_i32, %c0_i32_0 : i32, i32
  }
  func.func @transform_5(%arg0: i32) -> (i32, i32) {
    %c0_i32 = arith.constant 0 : i32
    %c0_i32_0 = arith.constant 0 : i32
    %c0_i32_1 = arith.constant 0 : i32
    return %c0_i32, %c0_i32_0 : i32, i32
  }
  func.func @transform_6(%arg0: i32) -> (i32, i32) {
    %c0_i32 = arith.constant 0 : i32
    %c0_i32_0 = arith.constant 0 : i32
    %c0_i32_1 = arith.constant 0 : i32
    return %c0_i32, %c0_i32_0 : i32, i32
  }
  func.func @transform_7(%arg0: i32) -> (i32, i32) {
    %c0_i32 = arith.constant 0 : i32
    %c0_i32_0 = arith.constant 0 : i32
    return %arg0, %c0_i32 : i32, i32
  }
}

module attributes {stable_mosaic.version = 11 : i64} {
  func.func @_ffn_ln_kernel(%arg0: i32, %arg1: memref<16x32xf32, #tpu.memory_space<vmem>>, %arg2: memref<32x64xf32, #tpu.memory_space<vmem>>, %arg3: memref<1x64xf32, #tpu.memory_space<vmem>>, %arg4: memref<64x32xf32, #tpu.memory_space<vmem>>, %arg5: memref<1x32xf32, #tpu.memory_space<vmem>>, %arg6: memref<1x32xf32, #tpu.memory_space<vmem>>, %arg7: memref<1x32xf32, #tpu.memory_space<vmem>>, %arg8: memref<16x32xf32, #tpu.memory_space<vmem>>) attributes {dimension_semantics = [#tpu.dimension_semantics<parallel>], iteration_bounds = array<i64: 1>, scalar_prefetch = 0 : i64, scratch_operands = 0 : i64, tpu.core_type = #tpu.core_type<tc>, window_params = [{transform_indices = @transform_0, window_bounds = array<i64: 16, 32>}, {pipeline_mode = #tpu.pipeline_mode<synchronous>, transform_indices = @transform_1, window_bounds = array<i64: 32, 64>}, {pipeline_mode = #tpu.pipeline_mode<synchronous>, transform_indices = @transform_2, window_bounds = array<i64: 1, 64>}, {pipeline_mode = #tpu.pipeline_mode<synchronous>, transform_indices = @transform_3, window_bounds = array<i64: 64, 32>}, {pipeline_mode = #tpu.pipeline_mode<synchronous>, transform_indices = @transform_4, window_bounds = array<i64: 1, 32>}, {pipeline_mode = #tpu.pipeline_mode<synchronous>, transform_indices = @transform_5, window_bounds = array<i64: 1, 32>}, {pipeline_mode = #tpu.pipeline_mode<synchronous>, transform_indices = @transform_6, window_bounds = array<i64: 1, 32>}, {transform_indices = @transform_7, window_bounds = array<i64: 16, 32>}]} {
    %c0 = arith.constant 0 : index
    %c0_0 = arith.constant 0 : index
    %0 = vector.load %arg1[%c0, %c0_0] : memref<16x32xf32, #tpu.memory_space<vmem>>, vector<16x32xf32>
    %c0_1 = arith.constant 0 : index
    %c0_2 = arith.constant 0 : index
    %1 = vector.load %arg2[%c0_1, %c0_2] : memref<32x64xf32, #tpu.memory_space<vmem>>, vector<32x64xf32>
    %cst = arith.constant dense<0.000000e+00> : vector<16x64xf32>
    %2 = tpu.matmul %0, %1, %cst {dimension_numbers = #tpu.dot_dimension_numbers<[1], [0], [0], [1], [0, 0, 1, 1], [], []>} : vector<16x32xf32>, vector<32x64xf32>, vector<16x64xf32> -> vector<16x64xf32>
    %c0_3 = arith.constant 0 : index
    %c0_4 = arith.constant 0 : index
    %3 = vector.load %arg3[%c0_3, %c0_4] : memref<1x64xf32, #tpu.memory_space<vmem>>, vector<1x64xf32>
    %4 = vector.broadcast %3 : vector<1x64xf32> to vector<16x64xf32>
    %5 = arith.addf %2, %4 : vector<16x64xf32>
    %6 = arith.mulf %5, %5 : vector<16x64xf32>
    %7 = arith.mulf %5, %6 : vector<16x64xf32>
    %cst_5 = arith.constant 4.471500e-02 : f32
    %8 = vector.broadcast %cst_5 : f32 to vector<16x64xf32>
    %9 = arith.mulf %8, %7 : vector<16x64xf32>
    %10 = arith.addf %5, %9 : vector<16x64xf32>
    %cst_6 = arith.constant 0.797884583 : f32
    %11 = vector.broadcast %cst_6 : f32 to vector<16x64xf32>
    %12 = arith.mulf %11, %10 : vector<16x64xf32>
    %13 = math.tanh %12 : vector<16x64xf32>
    %cst_7 = arith.constant 1.000000e+00 : f32
    %14 = vector.broadcast %cst_7 : f32 to vector<16x64xf32>
    %15 = arith.addf %14, %13 : vector<16x64xf32>
    %cst_8 = arith.constant 5.000000e-01 : f32
    %16 = vector.broadcast %cst_8 : f32 to vector<16x64xf32>
    %17 = arith.mulf %16, %15 : vector<16x64xf32>
    %18 = arith.mulf %5, %17 : vector<16x64xf32>
    %c0_9 = arith.constant 0 : index
    %c0_10 = arith.constant 0 : index
    %19 = vector.load %arg4[%c0_9, %c0_10] : memref<64x32xf32, #tpu.memory_space<vmem>>, vector<64x32xf32>
    %cst_11 = arith.constant dense<0.000000e+00> : vector<16x32xf32>
    %20 = tpu.matmul %18, %19, %cst_11 {dimension_numbers = #tpu.dot_dimension_numbers<[1], [0], [0], [1], [0, 0, 1, 1], [], []>} : vector<16x64xf32>, vector<64x32xf32>, vector<16x32xf32> -> vector<16x32xf32>
    %c0_12 = arith.constant 0 : index
    %c0_13 = arith.constant 0 : index
    %21 = vector.load %arg5[%c0_12, %c0_13] : memref<1x32xf32, #tpu.memory_space<vmem>>, vector<1x32xf32>
    %22 = vector.broadcast %21 : vector<1x32xf32> to vector<16x32xf32>
    %23 = arith.addf %20, %22 : vector<16x32xf32>
    %c0_14 = arith.constant 0 : index
    %c0_15 = arith.constant 0 : index
    %24 = vector.load %arg6[%c0_14, %c0_15] : memref<1x32xf32, #tpu.memory_space<vmem>>, vector<1x32xf32>
    %c0_16 = arith.constant 0 : index
    %c0_17 = arith.constant 0 : index
    %25 = vector.load %arg7[%c0_16, %c0_17] : memref<1x32xf32, #tpu.memory_space<vmem>>, vector<1x32xf32>
    %26 = arith.addf %0, %23 : vector<16x32xf32>
    %cst_18 = arith.constant dense<0.000000e+00> : vector<16xf32>
    %27 = vector.multi_reduction <add>, %26, %cst_18 [1] : vector<16x32xf32> to vector<16xf32>
    %28 = vector.shape_cast %27 : vector<16xf32> to vector<16x1xf32>
    %cst_19 = arith.constant 3.200000e+01 : f32
    %29 = vector.broadcast %cst_19 : f32 to vector<16x1xf32>
    %30 = arith.divf %28, %29 : vector<16x1xf32>
    %31 = vector.broadcast %30 : vector<16x1xf32> to vector<16x32xf32>
    %32 = arith.subf %26, %31 : vector<16x32xf32>
    %33 = arith.mulf %32, %32 : vector<16x32xf32>
    %cst_20 = arith.constant dense<0.000000e+00> : vector<16xf32>
    %34 = vector.multi_reduction <add>, %33, %cst_20 [1] : vector<16x32xf32> to vector<16xf32>
    %35 = vector.shape_cast %34 : vector<16xf32> to vector<16x1xf32>
    %cst_21 = arith.constant 3.200000e+01 : f32
    %36 = vector.broadcast %cst_21 : f32 to vector<16x1xf32>
    %37 = arith.divf %35, %36 : vector<16x1xf32>
    %38 = vector.broadcast %30 : vector<16x1xf32> to vector<16x32xf32>
    %39 = arith.subf %26, %38 : vector<16x32xf32>
    %cst_22 = arith.constant 9.99999996E-13 : f32
    %40 = vector.broadcast %cst_22 : f32 to vector<16x1xf32>
    %41 = arith.addf %37, %40 : vector<16x1xf32>
    %42 = math.rsqrt %41 : vector<16x1xf32>
    %43 = vector.broadcast %42 : vector<16x1xf32> to vector<16x32xf32>
    %44 = arith.mulf %39, %43 : vector<16x32xf32>
    %45 = vector.broadcast %24 : vector<1x32xf32> to vector<16x32xf32>
    %46 = arith.mulf %44, %45 : vector<16x32xf32>
    %47 = vector.broadcast %25 : vector<1x32xf32> to vector<16x32xf32>
    %48 = arith.addf %46, %47 : vector<16x32xf32>
    %c0_23 = arith.constant 0 : index
    %c0_24 = arith.constant 0 : index
    %49 = vector.load %arg8[%c0_23, %c0_24] : memref<16x32xf32, #tpu.memory_space<vmem>>, vector<16x32xf32>
    tpu.vector_store %arg8[%c0_23, %c0_24], %48 {strides = array<i32>} : memref<16x32xf32, #tpu.memory_space<vmem>>, vector<16x32xf32>,
    return
  }
  func.func @transform_0(%arg0: i32) -> (i32, i32) {
    %c0_i32 = arith.constant 0 : i32
    %c0_i32_0 = arith.constant 0 : i32
    return %arg0, %c0_i32 : i32, i32
  }
  func.func @transform_1(%arg0: i32) -> (i32, i32) {
    %c0_i32 = arith.constant 0 : i32
    %c0_i32_0 = arith.constant 0 : i32
    %c0_i32_1 = arith.constant 0 : i32
    return %c0_i32, %c0_i32_0 : i32, i32
  }
  func.func @transform_2(%arg0: i32) -> (i32, i32) {
    %c0_i32 = arith.constant 0 : i32
    %c0_i32_0 = arith.constant 0 : i32
    %c0_i32_1 = arith.constant 0 : i32
    return %c0_i32, %c0_i32_0 : i32, i32
  }
  func.func @transform_3(%arg0: i32) -> (i32, i32) {
    %c0_i32 = arith.constant 0 : i32
    %c0_i32_0 = arith.constant 0 : i32
    %c0_i32_1 = arith.constant 0 : i32
    return %c0_i32, %c0_i32_0 : i32, i32
  }
  func.func @transform_4(%arg0: i32) -> (i32, i32) {
    %c0_i32 = arith.constant 0 : i32
    %c0_i32_0 = arith.constant 0 : i32
    %c0_i32_1 = arith.constant 0 : i32
    return %c0_i32, %c0_i32_0 : i32, i32
  }
  func.func @transform_5(%arg0: i32) -> (i32, i32) {
    %c0_i32 = arith.constant 0 : i32
    %c0_i32_0 = arith.constant 0 : i32
    %c0_i32_1 = arith.constant 0 : i32
    return %c0_i32, %c0_i32_0 : i32, i32
  }
  func.func @transform_6(%arg0: i32) -> (i32, i32) {
    %c0_i32 = arith.constant 0 : i32
    %c0_i32_0 = arith.constant 0 : i32
    %c0_i32_1 = arith.constant 0 : i32
    return %c0_i32, %c0_i32_0 : i32, i32
  }
  func.func @transform_7(%arg0: i32) -> (i32, i32) {
    %c0_i32 = arith.constant 0 : i32
    %c0_i32_0 = arith.constant 0 : i32
    return %arg0, %c0_i32 : i32, i32
  }
}

module attributes {stable_mosaic.version = 11 : i64} {
  func.func @_mha_self_kernel(%arg0: i32, %arg1: memref<1x8x32xf32, #tpu.memory_space<vmem>>, %arg2: memref<32x96xf32, #tpu.memory_space<vmem>>, %arg3: memref<1x96xf32, #tpu.memory_space<vmem>>, %arg4: memref<32x32xf32, #tpu.memory_space<vmem>>, %arg5: memref<1x32xf32, #tpu.memory_space<vmem>>, %arg6: memref<1x8x8xi8, #tpu.memory_space<vmem>>, %arg7: memref<1x32xf32, #tpu.memory_space<vmem>>, %arg8: memref<1x32xf32, #tpu.memory_space<vmem>>, %arg9: memref<1x8x32xf32, #tpu.memory_space<vmem>>, %arg10: memref<1x4x8x8xf32, #tpu.memory_space<vmem>>) attributes {dimension_semantics = [#tpu.dimension_semantics<parallel>], iteration_bounds = array<i64: 2>, scalar_prefetch = 0 : i64, scratch_operands = 0 : i64, tpu.core_type = #tpu.core_type<tc>, window_params = [{transform_indices = @transform_0, window_bounds = array<i64: 1, 8, 32>}, {pipeline_mode = #tpu.pipeline_mode<synchronous>, transform_indices = @transform_1, window_bounds = array<i64: 32, 96>}, {pipeline_mode = #tpu.pipeline_mode<synchronous>, transform_indices = @transform_2, window_bounds = array<i64: 1, 96>}, {pipeline_mode = #tpu.pipeline_mode<synchronous>, transform_indices = @transform_3, window_bounds = array<i64: 32, 32>}, {pipeline_mode = #tpu.pipeline_mode<synchronous>, transform_indices = @transform_4, window_bounds = array<i64: 1, 32>}, {transform_indices = @transform_5, window_bounds = array<i64: 1, 8, 8>}, {pipeline_mode = #tpu.pipeline_mode<synchronous>, transform_indices = @transform_6, window_bounds = array<i64: 1, 32>}, {pipeline_mode = #tpu.pipeline_mode<synchronous>, transform_indices = @transform_7, window_bounds = array<i64: 1, 32>}, {transform_indices = @transform_8, window_bounds = array<i64: 1, 8, 32>}, {transform_indices = @transform_9, window_bounds = array<i64: 1, 4, 8, 8>}]} {
    %c0 = arith.constant 0 : index
    %c0_0 = arith.constant 0 : index
    %c0_1 = arith.constant 0 : index
    %0 = vector.load %arg1[%c0, %c0_0, %c0_1] : memref<1x8x32xf32, #tpu.memory_space<vmem>>, vector<1x8x32xf32>
    %1 = vector.shape_cast %0 : vector<1x8x32xf32> to vector<8x32xf32>
    %c0_2 = arith.constant 0 : index
    %c0_3 = arith.constant 0 : index
    %2 = vector.load %arg2[%c0_2, %c0_3] : memref<32x96xf32, #tpu.memory_space<vmem>>, vector<32x96xf32>
    %cst = arith.constant dense<0.000000e+00> : vector<8x96xf32>
    %3 = tpu.matmul %1, %2, %cst {dimension_numbers = #tpu.dot_dimension_numbers<[1], [0], [0], [1], [0, 0, 1, 1], [], []>} : vector<8x32xf32>, vector<32x96xf32>, vector<8x96xf32> -> vector<8x96xf32>
    %c0_4 = arith.constant 0 : index
    %c0_5 = arith.constant 0 : index
    %4 = vector.load %arg3[%c0_4, %c0_5] : memref<1x96xf32, #tpu.memory_space<vmem>>, vector<1x96xf32>
    %5 = vector.broadcast %4 : vector<1x96xf32> to vector<8x96xf32>
    %6 = arith.addf %3, %5 : vector<8x96xf32>
    %c0_6 = arith.constant 0 : index
    %c0_7 = arith.constant 0 : index
    %c0_8 = arith.constant 0 : index
    %7 = vector.load %arg6[%c0_6, %c0_7, %c0_8] : memref<1x8x8xi8, #tpu.memory_space<vmem>>, vector<1x8x8xi8>
    %8 = vector.shape_cast %7 : vector<1x8x8xi8> to vector<8x8xi8>
    %c0_i8 = arith.constant 0 : i8
    %9 = vector.broadcast %c0_i8 : i8 to vector<8x8xi8>
    %10 = arith.cmpi ne, %8, %9 : vector<8x8xi8>
    %11 = vector.extract_strided_slice %6 {offsets = [0, 0], sizes = [8, 32], strides = [1, 1]} : vector<8x96xf32> to vector<8x32xf32>
    %12 = vector.extract_strided_slice %6 {offsets = [0, 32], sizes = [8, 32], strides = [1, 1]} : vector<8x96xf32> to vector<8x32xf32>
    %13 = vector.extract_strided_slice %6 {offsets = [0, 64], sizes = [8, 32], strides = [1, 1]} : vector<8x96xf32> to vector<8x32xf32>
    %14 = vector.extract_strided_slice %11 {offsets = [0, 0], sizes = [8, 8], strides = [1, 1]} : vector<8x32xf32> to vector<8x8xf32>
    %15 = vector.extract_strided_slice %12 {offsets = [0, 0], sizes = [8, 8], strides = [1, 1]} : vector<8x32xf32> to vector<8x8xf32>
    %16 = vector.extract_strided_slice %13 {offsets = [0, 0], sizes = [8, 8], strides = [1, 1]} : vector<8x32xf32> to vector<8x8xf32>
    %cst_9 = arith.constant dense<0.000000e+00> : vector<8x8xf32>
    %17 = tpu.matmul %14, %15, %cst_9 {dimension_numbers = #tpu.dot_dimension_numbers<[1], [1], [0], [0], [0, 0, 1, 0], [], []>} : vector<8x8xf32>, vector<8x8xf32>, vector<8x8xf32> -> vector<8x8xf32>
    %cst_10 = arith.constant 0.353553385 : f32
    %18 = vector.broadcast %cst_10 : f32 to vector<8x8xf32>
    %19 = arith.mulf %17, %18 : vector<8x8xf32>
    %cst_11 = arith.constant -1.000000e+09 : f32
    %20 = vector.broadcast %cst_11 : f32 to vector<8x8xf32>
    %21 = arith.select %10, %20, %19 : vector<8x8xi1>, vector<8x8xf32>
    %cst_12 = arith.constant dense<0xFF800000> : vector<8xf32>
    %22 = vector.multi_reduction <maximumf>, %21, %cst_12 [1] : vector<8x8xf32> to vector<8xf32>
    %23 = vector.shape_cast %22 : vector<8xf32> to vector<8x1xf32>
    %24 = vector.broadcast %23 : vector<8x1xf32> to vector<8x8xf32>
    %25 = arith.subf %21, %24 : vector<8x8xf32>
    %26 = math.exp %25 : vector<8x8xf32>
    %cst_13 = arith.constant dense<0.000000e+00> : vector<8xf32>
    %27 = vector.multi_reduction <add>, %26, %cst_13 [1] : vector<8x8xf32> to vector<8xf32>
    %28 = vector.shape_cast %27 : vector<8xf32> to vector<8x1xf32>
    %29 = tpu.reciprocal %28 {approx = true} : vector<8x1xf32> -> vector<8x1xf32>
    %30 = vector.broadcast %29 : vector<8x1xf32> to vector<8x8xf32>
    %31 = arith.mulf %26, %30 : vector<8x8xf32>
    %c0_14 = arith.constant 0 : index
    %c0_15 = arith.constant 0 : index
    %c0_16 = arith.constant 0 : index
    %c0_17 = arith.constant 0 : index
    %32 = vector.load %arg10[%c0_14, %c0_15, %c0_16, %c0_17] : memref<1x4x8x8xf32, #tpu.memory_space<vmem>>, vector<1x1x8x8xf32>
    %33 = vector.shape_cast %32 : vector<1x1x8x8xf32> to vector<8x8xf32>
    %34 = vector.shape_cast %31 : vector<8x8xf32> to vector<1x1x8x8xf32>
    tpu.vector_store %arg10[%c0_14, %c0_15, %c0_16, %c0_17], %34 {strides = array<i32>} : memref<1x4x8x8xf32, #tpu.memory_space<vmem>>, vector<1x1x8x8xf32>,
    %cst_18 = arith.constant dense<0.000000e+00> : vector<8x8xf32>
    %35 = tpu.matmul %31, %16, %cst_18 {dimension_numbers = #tpu.dot_dimension_numbers<[1], [0], [0], [1], [0, 0, 1, 1], [], []>} : vector<8x8xf32>, vector<8x8xf32>, vector<8x8xf32> -> vector<8x8xf32>
    %36 = vector.extract_strided_slice %11 {offsets = [0, 8], sizes = [8, 8], strides = [1, 1]} : vector<8x32xf32> to vector<8x8xf32>
    %37 = vector.extract_strided_slice %12 {offsets = [0, 8], sizes = [8, 8], strides = [1, 1]} : vector<8x32xf32> to vector<8x8xf32>
    %38 = vector.extract_strided_slice %13 {offsets = [0, 8], sizes = [8, 8], strides = [1, 1]} : vector<8x32xf32> to vector<8x8xf32>
    %cst_19 = arith.constant dense<0.000000e+00> : vector<8x8xf32>
    %39 = tpu.matmul %36, %37, %cst_19 {dimension_numbers = #tpu.dot_dimension_numbers<[1], [1], [0], [0], [0, 0, 1, 0], [], []>} : vector<8x8xf32>, vector<8x8xf32>, vector<8x8xf32> -> vector<8x8xf32>
    %cst_20 = arith.constant 0.353553385 : f32
    %40 = vector.broadcast %cst_20 : f32 to vector<8x8xf32>
    %41 = arith.mulf %39, %40 : vector<8x8xf32>
    %cst_21 = arith.constant -1.000000e+09 : f32
    %42 = vector.broadcast %cst_21 : f32 to vector<8x8xf32>
    %43 = arith.select %10, %42, %41 : vector<8x8xi1>, vector<8x8xf32>
    %cst_22 = arith.constant dense<0xFF800000> : vector<8xf32>
    %44 = vector.multi_reduction <maximumf>, %43, %cst_22 [1] : vector<8x8xf32> to vector<8xf32>
    %45 = vector.shape_cast %44 : vector<8xf32> to vector<8x1xf32>
    %46 = vector.broadcast %45 : vector<8x1xf32> to vector<8x8xf32>
    %47 = arith.subf %43, %46 : vector<8x8xf32>
    %48 = math.exp %47 : vector<8x8xf32>
    %cst_23 = arith.constant dense<0.000000e+00> : vector<8xf32>
    %49 = vector.multi_reduction <add>, %48, %cst_23 [1] : vector<8x8xf32> to vector<8xf32>
    %50 = vector.shape_cast %49 : vector<8xf32> to vector<8x1xf32>
    %51 = tpu.reciprocal %50 {approx = true} : vector<8x1xf32> -> vector<8x1xf32>
    %52 = vector.broadcast %51 : vector<8x1xf32> to vector<8x8xf32>
    %53 = arith.mulf %48, %52 : vector<8x8xf32>
    %c0_24 = arith.constant 0 : index
    %c1 = arith.constant 1 : index
    %c0_25 = arith.constant 0 : index
    %c0_26 = arith.constant 0 : index
    %54 = vector.load %arg10[%c0_24, %c1, %c0_25, %c0_26] : memref<1x4x8x8xf32, #tpu.memory_space<vmem>>, vector<1x1x8x8xf32>
    %55 = vector.shape_cast %54 : vector<1x1x8x8xf32> to vector<8x8xf32>
    %56 = vector.shape_cast %53 : vector<8x8xf32> to vector<1x1x8x8xf32>
    tpu.vector_store %arg10[%c0_24, %c1, %c0_25, %c0_26], %56 {strides = array<i32>} : memref<1x4x8x8xf32, #tpu.memory_space<vmem>>, vector<1x1x8x8xf32>,
    %cst_27 = arith.constant dense<0.000000e+00> : vector<8x8xf32>
    %57 = tpu.matmul %53, %38, %cst_27 {dimension_numbers = #tpu.dot_dimension_numbers<[1], [0], [0], [1], [0, 0, 1, 1], [], []>} : vector<8x8xf32>, vector<8x8xf32>, vector<8x8xf32> -> vector<8x8xf32>
    %58 = vector.extract_strided_slice %11 {offsets = [0, 16], sizes = [8, 8], strides = [1, 1]} : vector<8x32xf32> to vector<8x8xf32>
    %59 = vector.extract_strided_slice %12 {offsets = [0, 16], sizes = [8, 8], strides = [1, 1]} : vector<8x32xf32> to vector<8x8xf32>
    %60 = vector.extract_strided_slice %13 {offsets = [0, 16], sizes = [8, 8], strides = [1, 1]} : vector<8x32xf32> to vector<8x8xf32>
    %cst_28 = arith.constant dense<0.000000e+00> : vector<8x8xf32>
    %61 = tpu.matmul %58, %59, %cst_28 {dimension_numbers = #tpu.dot_dimension_numbers<[1], [1], [0], [0], [0, 0, 1, 0], [], []>} : vector<8x8xf32>, vector<8x8xf32>, vector<8x8xf32> -> vector<8x8xf32>
    %cst_29 = arith.constant 0.353553385 : f32
    %62 = vector.broadcast %cst_29 : f32 to vector<8x8xf32>
    %63 = arith.mulf %61, %62 : vector<8x8xf32>
    %cst_30 = arith.constant -1.000000e+09 : f32
    %64 = vector.broadcast %cst_30 : f32 to vector<8x8xf32>
    %65 = arith.select %10, %64, %63 : vector<8x8xi1>, vector<8x8xf32>
    %cst_31 = arith.constant dense<0xFF800000> : vector<8xf32>
    %66 = vector.multi_reduction <maximumf>, %65, %cst_31 [1] : vector<8x8xf32> to vector<8xf32>
    %67 = vector.shape_cast %66 : vector<8xf32> to vector<8x1xf32>
    %68 = vector.broadcast %67 : vector<8x1xf32> to vector<8x8xf32>
    %69 = arith.subf %65, %68 : vector<8x8xf32>
    %70 = math.exp %69 : vector<8x8xf32>
    %cst_32 = arith.constant dense<0.000000e+00> : vector<8xf32>
    %71 = vector.multi_reduction <add>, %70, %cst_32 [1] : vector<8x8xf32> to vector<8xf32>
    %72 = vector.shape_cast %71 : vector<8xf32> to vector<8x1xf32>
    %73 = tpu.reciprocal %72 {approx = true} : vector<8x1xf32> -> vector<8x1xf32>
    %74 = vector.broadcast %73 : vector<8x1xf32> to vector<8x8xf32>
    %75 = arith.mulf %70, %74 : vector<8x8xf32>
    %c0_33 = arith.constant 0 : index
    %c2 = arith.constant 2 : index
    %c0_34 = arith.constant 0 : index
    %c0_35 = arith.constant 0 : index
    %76 = vector.load %arg10[%c0_33, %c2, %c0_34, %c0_35] : memref<1x4x8x8xf32, #tpu.memory_space<vmem>>, vector<1x1x8x8xf32>
    %77 = vector.shape_cast %76 : vector<1x1x8x8xf32> to vector<8x8xf32>
    %78 = vector.shape_cast %75 : vector<8x8xf32> to vector<1x1x8x8xf32>
    tpu.vector_store %arg10[%c0_33, %c2, %c0_34, %c0_35], %78 {strides = array<i32>} : memref<1x4x8x8xf32, #tpu.memory_space<vmem>>, vector<1x1x8x8xf32>,
    %cst_36 = arith.constant dense<0.000000e+00> : vector<8x8xf32>
    %79 = tpu.matmul %75, %60, %cst_36 {dimension_numbers = #tpu.dot_dimension_numbers<[1], [0], [0], [1], [0, 0, 1, 1], [], []>} : vector<8x8xf32>, vector<8x8xf32>, vector<8x8xf32> -> vector<8x8xf32>
    %80 = vector.extract_strided_slice %11 {offsets = [0, 24], sizes = [8, 8], strides = [1, 1]} : vector<8x32xf32> to vector<8x8xf32>
    %81 = vector.extract_strided_slice %12 {offsets = [0, 24], sizes = [8, 8], strides = [1, 1]} : vector<8x32xf32> to vector<8x8xf32>
    %82 = vector.extract_strided_slice %13 {offsets = [0, 24], sizes = [8, 8], strides = [1, 1]} : vector<8x32xf32> to vector<8x8xf32>
    %cst_37 = arith.constant dense<0.000000e+00> : vector<8x8xf32>
    %83 = tpu.matmul %80, %81, %cst_37 {dimension_numbers = #tpu.dot_dimension_numbers<[1], [1], [0], [0], [0, 0, 1, 0], [], []>} : vector<8x8xf32>, vector<8x8xf32>, vector<8x8xf32> -> vector<8x8xf32>
    %cst_38 = arith.constant 0.353553385 : f32
    %84 = vector.broadcast %cst_38 : f32 to vector<8x8xf32>
    %85 = arith.mulf %83, %84 : vector<8x8xf32>
    %cst_39 = arith.constant -1.000000e+09 : f32
    %86 = vector.broadcast %cst_39 : f32 to vector<8x8xf32>
    %87 = arith.select %10, %86, %85 : vector<8x8xi1>, vector<8x8xf32>
    %cst_40 = arith.constant dense<0xFF800000> : vector<8xf32>
    %88 = vector.multi_reduction <maximumf>, %87, %cst_40 [1] : vector<8x8xf32> to vector<8xf32>
    %89 = vector.shape_cast %88 : vector<8xf32> to vector<8x1xf32>
    %90 = vector.broadcast %89 : vector<8x1xf32> to vector<8x8xf32>
    %91 = arith.subf %87, %90 : vector<8x8xf32>
    %92 = math.exp %91 : vector<8x8xf32>
    %cst_41 = arith.constant dense<0.000000e+00> : vector<8xf32>
    %93 = vector.multi_reduction <add>, %92, %cst_41 [1] : vector<8x8xf32> to vector<8xf32>
    %94 = vector.shape_cast %93 : vector<8xf32> to vector<8x1xf32>
    %95 = tpu.reciprocal %94 {approx = true} : vector<8x1xf32> -> vector<8x1xf32>
    %96 = vector.broadcast %95 : vector<8x1xf32> to vector<8x8xf32>
    %97 = arith.mulf %92, %96 : vector<8x8xf32>
    %c0_42 = arith.constant 0 : index
    %c3 = arith.constant 3 : index
    %c0_43 = arith.constant 0 : index
    %c0_44 = arith.constant 0 : index
    %98 = vector.load %arg10[%c0_42, %c3, %c0_43, %c0_44] : memref<1x4x8x8xf32, #tpu.memory_space<vmem>>, vector<1x1x8x8xf32>
    %99 = vector.shape_cast %98 : vector<1x1x8x8xf32> to vector<8x8xf32>
    %100 = vector.shape_cast %97 : vector<8x8xf32> to vector<1x1x8x8xf32>
    tpu.vector_store %arg10[%c0_42, %c3, %c0_43, %c0_44], %100 {strides = array<i32>} : memref<1x4x8x8xf32, #tpu.memory_space<vmem>>, vector<1x1x8x8xf32>,
    %cst_45 = arith.constant dense<0.000000e+00> : vector<8x8xf32>
    %101 = tpu.matmul %97, %82, %cst_45 {dimension_numbers = #tpu.dot_dimension_numbers<[1], [0], [0], [1], [0, 0, 1, 1], [], []>} : vector<8x8xf32>, vector<8x8xf32>, vector<8x8xf32> -> vector<8x8xf32>
    %102 = tpu.concatenate %35, %57, %79, %101 in 1 : vector<8x8xf32>, vector<8x8xf32>, vector<8x8xf32>, vector<8x8xf32> -> vector<8x32xf32>
    %c0_46 = arith.constant 0 : index
    %c0_47 = arith.constant 0 : index
    %103 = vector.load %arg4[%c0_46, %c0_47] : memref<32x32xf32, #tpu.memory_space<vmem>>, vector<32x32xf32>
    %cst_48 = arith.constant dense<0.000000e+00> : vector<8x32xf32>
    %104 = tpu.matmul %102, %103, %cst_48 {dimension_numbers = #tpu.dot_dimension_numbers<[1], [0], [0], [1], [0, 0, 1, 1], [], []>} : vector<8x32xf32>, vector<32x32xf32>, vector<8x32xf32> -> vector<8x32xf32>
    %c0_49 = arith.constant 0 : index
    %c0_50 = arith.constant 0 : index
    %105 = vector.load %arg5[%c0_49, %c0_50] : memref<1x32xf32, #tpu.memory_space<vmem>>, vector<1x32xf32>
    %106 = vector.broadcast %105 : vector<1x32xf32> to vector<8x32xf32>
    %107 = arith.addf %104, %106 : vector<8x32xf32>
    %c0_51 = arith.constant 0 : index
    %c0_52 = arith.constant 0 : index
    %108 = vector.load %arg7[%c0_51, %c0_52] : memref<1x32xf32, #tpu.memory_space<vmem>>, vector<1x32xf32>
    %c0_53 = arith.constant 0 : index
    %c0_54 = arith.constant 0 : index
    %109 = vector.load %arg8[%c0_53, %c0_54] : memref<1x32xf32, #tpu.memory_space<vmem>>, vector<1x32xf32>
    %110 = arith.addf %1, %107 : vector<8x32xf32>
    %cst_55 = arith.constant dense<0.000000e+00> : vector<8xf32>
    %111 = vector.multi_reduction <add>, %110, %cst_55 [1] : vector<8x32xf32> to vector<8xf32>
    %112 = vector.shape_cast %111 : vector<8xf32> to vector<8x1xf32>
    %cst_56 = arith.constant 3.200000e+01 : f32
    %113 = vector.broadcast %cst_56 : f32 to vector<8x1xf32>
    %114 = arith.divf %112, %113 : vector<8x1xf32>
    %115 = vector.broadcast %114 : vector<8x1xf32> to vector<8x32xf32>
    %116 = arith.subf %110, %115 : vector<8x32xf32>
    %117 = arith.mulf %116, %116 : vector<8x32xf32>
    %cst_57 = arith.constant dense<0.000000e+00> : vector<8xf32>
    %118 = vector.multi_reduction <add>, %117, %cst_57 [1] : vector<8x32xf32> to vector<8xf32>
    %119 = vector.shape_cast %118 : vector<8xf32> to vector<8x1xf32>
    %cst_58 = arith.constant 3.200000e+01 : f32
    %120 = vector.broadcast %cst_58 : f32 to vector<8x1xf32>
    %121 = arith.divf %119, %120 : vector<8x1xf32>
    %122 = vector.broadcast %114 : vector<8x1xf32> to vector<8x32xf32>
    %123 = arith.subf %110, %122 : vector<8x32xf32>
    %cst_59 = arith.constant 9.99999996E-13 : f32
    %124 = vector.broadcast %cst_59 : f32 to vector<8x1xf32>
    %125 = arith.addf %121, %124 : vector<8x1xf32>
    %126 = math.rsqrt %125 : vector<8x1xf32>
    %127 = vector.broadcast %126 : vector<8x1xf32> to vector<8x32xf32>
    %128 = arith.mulf %123, %127 : vector<8x32xf32>
    %129 = vector.broadcast %108 : vector<1x32xf32> to vector<8x32xf32>
    %130 = arith.mulf %128, %129 : vector<8x32xf32>
    %131 = vector.broadcast %109 : vector<1x32xf32> to vector<8x32xf32>
    %132 = arith.addf %130, %131 : vector<8x32xf32>
    %c0_60 = arith.constant 0 : index
    %c0_61 = arith.constant 0 : index
    %c0_62 = arith.constant 0 : index
    %133 = vector.load %arg9[%c0_60, %c0_61, %c0_62] : memref<1x8x32xf32, #tpu.memory_space<vmem>>, vector<1x8x32xf32>
    %134 = vector.shape_cast %133 : vector<1x8x32xf32> to vector<8x32xf32>
    %135 = vector.shape_cast %132 : vector<8x32xf32> to vector<1x8x32xf32>
    tpu.vector_store %arg9[%c0_60, %c0_61, %c0_62], %135 {strides = array<i32>} : memref<1x8x32xf32, #tpu.memory_space<vmem>>, vector<1x8x32xf32>,
    return
  }
  func.func @transform_0(%arg0: i32) -> (i32, i32, i32) {
    %c0_i32 = arith.constant 0 : i32
    %c0_i32_0 = arith.constant 0 : i32
    %c0_i32_1 = arith.constant 0 : i32
    return %arg0, %c0_i32, %c0_i32_0 : i32, i32, i32
  }
  func.func @transform_1(%arg0: i32) -> (i32, i32) {
    %c0_i32 = arith.constant 0 : i32
    %c0_i32_0 = arith.constant 0 : i32
    %c0_i32_1 = arith.constant 0 : i32
    return %c0_i32, %c0_i32_0 : i32, i32
  }
  func.func @transform_2(%arg0: i32) -> (i32, i32) {
    %c0_i32 = arith.constant 0 : i32
    %c0_i32_0 = arith.constant 0 : i32
    %c0_i32_1 = arith.constant 0 : i32
    return %c0_i32, %c0_i32_0 : i32, i32
  }
  func.func @transform_3(%arg0: i32) -> (i32, i32) {
    %c0_i32 = arith.constant 0 : i32
    %c0_i32_0 = arith.constant 0 : i32
    %c0_i32_1 = arith.constant 0 : i32
    return %c0_i32, %c0_i32_0 : i32, i32
  }
  func.func @transform_4(%arg0: i32) -> (i32, i32) {
    %c0_i32 = arith.constant 0 : i32
    %c0_i32_0 = arith.constant 0 : i32
    %c0_i32_1 = arith.constant 0 : i32
    return %c0_i32, %c0_i32_0 : i32, i32
  }
  func.func @transform_5(%arg0: i32) -> (i32, i32, i32) {
    %c0_i32 = arith.constant 0 : i32
    %c0_i32_0 = arith.constant 0 : i32
    %c0_i32_1 = arith.constant 0 : i32
    return %arg0, %c0_i32, %c0_i32_0 : i32, i32, i32
  }
  func.func @transform_6(%arg0: i32) -> (i32, i32) {
    %c0_i32 = arith.constant 0 : i32
    %c0_i32_0 = arith.constant 0 : i32
    %c0_i32_1 = arith.constant 0 : i32
    return %c0_i32, %c0_i32_0 : i32, i32
  }
  func.func @transform_7(%arg0: i32) -> (i32, i32) {
    %c0_i32 = arith.constant 0 : i32
    %c0_i32_0 = arith.constant 0 : i32
    %c0_i32_1 = arith.constant 0 : i32
    return %c0_i32, %c0_i32_0 : i32, i32
  }
  func.func @transform_8(%arg0: i32) -> (i32, i32, i32) {
    %c0_i32 = arith.constant 0 : i32
    %c0_i32_0 = arith.constant 0 : i32
    %c0_i32_1 = arith.constant 0 : i32
    return %arg0, %c0_i32, %c0_i32_0 : i32, i32, i32
  }
  func.func @transform_9(%arg0: i32) -> (i32, i32, i32, i32) {
    %c0_i32 = arith.constant 0 : i32
    %c0_i32_0 = arith.constant 0 : i32
    %c0_i32_1 = arith.constant 0 : i32
    %c0_i32_2 = arith.constant 0 : i32
    return %arg0, %c0_i32, %c0_i32_0, %c0_i32_1 : i32, i32, i32, i32
  }
}

module attributes {stable_mosaic.version = 11 : i64} {
  func.func @_mha_cross_kernel(%arg0: i32, %arg1: memref<1x8x32xf32, #tpu.memory_space<vmem>>, %arg2: memref<1x8x32xf32, #tpu.memory_space<vmem>>, %arg3: memref<32x96xf32, #tpu.memory_space<vmem>>, %arg4: memref<1x96xf32, #tpu.memory_space<vmem>>, %arg5: memref<32x32xf32, #tpu.memory_space<vmem>>, %arg6: memref<1x32xf32, #tpu.memory_space<vmem>>, %arg7: memref<1x8x8xi8, #tpu.memory_space<vmem>>, %arg8: memref<1x32xf32, #tpu.memory_space<vmem>>, %arg9: memref<1x32xf32, #tpu.memory_space<vmem>>, %arg10: memref<1x8x32xf32, #tpu.memory_space<vmem>>, %arg11: memref<1x4x8x8xf32, #tpu.memory_space<vmem>>) attributes {dimension_semantics = [#tpu.dimension_semantics<parallel>], iteration_bounds = array<i64: 2>, scalar_prefetch = 0 : i64, scratch_operands = 0 : i64, tpu.core_type = #tpu.core_type<tc>, window_params = [{transform_indices = @transform_0, window_bounds = array<i64: 1, 8, 32>}, {transform_indices = @transform_1, window_bounds = array<i64: 1, 8, 32>}, {pipeline_mode = #tpu.pipeline_mode<synchronous>, transform_indices = @transform_2, window_bounds = array<i64: 32, 96>}, {pipeline_mode = #tpu.pipeline_mode<synchronous>, transform_indices = @transform_3, window_bounds = array<i64: 1, 96>}, {pipeline_mode = #tpu.pipeline_mode<synchronous>, transform_indices = @transform_4, window_bounds = array<i64: 32, 32>}, {pipeline_mode = #tpu.pipeline_mode<synchronous>, transform_indices = @transform_5, window_bounds = array<i64: 1, 32>}, {transform_indices = @transform_6, window_bounds = array<i64: 1, 8, 8>}, {pipeline_mode = #tpu.pipeline_mode<synchronous>, transform_indices = @transform_7, window_bounds = array<i64: 1, 32>}, {pipeline_mode = #tpu.pipeline_mode<synchronous>, transform_indices = @transform_8, window_bounds = array<i64: 1, 32>}, {transform_indices = @transform_9, window_bounds = array<i64: 1, 8, 32>}, {transform_indices = @transform_10, window_bounds = array<i64: 1, 4, 8, 8>}]} {
    %c0 = arith.constant 0 : index
    %c0_0 = arith.constant 0 : index
    %c0_1 = arith.constant 0 : index
    %0 = vector.load %arg1[%c0, %c0_0, %c0_1] : memref<1x8x32xf32, #tpu.memory_space<vmem>>, vector<1x8x32xf32>
    %1 = vector.shape_cast %0 : vector<1x8x32xf32> to vector<8x32xf32>
    %c0_2 = arith.constant 0 : index
    %c0_3 = arith.constant 0 : index
    %c0_4 = arith.constant 0 : index
    %2 = vector.load %arg2[%c0_2, %c0_3, %c0_4] : memref<1x8x32xf32, #tpu.memory_space<vmem>>, vector<1x8x32xf32>
    %3 = vector.shape_cast %2 : vector<1x8x32xf32> to vector<8x32xf32>
    %c0_5 = arith.constant 0 : index
    %c0_6 = arith.constant 0 : index
    %4 = vector.load %arg3[%c0_5, %c0_6] : memref<32x96xf32, #tpu.memory_space<vmem>>, vector<32x96xf32>
    %c0_7 = arith.constant 0 : index
    %c0_8 = arith.constant 0 : index
    %5 = vector.load %arg4[%c0_7, %c0_8] : memref<1x96xf32, #tpu.memory_space<vmem>>, vector<1x96xf32>
    %6 = vector.extract_strided_slice %4 {offsets = [0, 0], sizes = [32, 32], strides = [1, 1]} : vector<32x96xf32> to vector<32x32xf32>
    %cst = arith.constant dense<0.000000e+00> : vector<8x32xf32>
    %7 = tpu.matmul %1, %6, %cst {dimension_numbers = #tpu.dot_dimension_numbers<[1], [0], [0], [1], [0, 0, 1, 1], [], []>} : vector<8x32xf32>, vector<32x32xf32>, vector<8x32xf32> -> vector<8x32xf32>
    %8 = vector.extract_strided_slice %5 {offsets = [0, 0], sizes = [1, 32], strides = [1, 1]} : vector<1x96xf32> to vector<1x32xf32>
    %9 = vector.broadcast %8 : vector<1x32xf32> to vector<8x32xf32>
    %10 = arith.addf %7, %9 : vector<8x32xf32>
    %11 = vector.extract_strided_slice %4 {offsets = [0, 32], sizes = [32, 64], strides = [1, 1]} : vector<32x96xf32> to vector<32x64xf32>
    %cst_9 = arith.constant dense<0.000000e+00> : vector<8x64xf32>
    %12 = tpu.matmul %3, %11, %cst_9 {dimension_numbers = #tpu.dot_dimension_numbers<[1], [0], [0], [1], [0, 0, 1, 1], [], []>} : vector<8x32xf32>, vector<32x64xf32>, vector<8x64xf32> -> vector<8x64xf32>
    %13 = vector.extract_strided_slice %5 {offsets = [0, 32], sizes = [1, 64], strides = [1, 1]} : vector<1x96xf32> to vector<1x64xf32>
    %14 = vector.broadcast %13 : vector<1x64xf32> to vector<8x64xf32>
    %15 = arith.addf %12, %14 : vector<8x64xf32>
    %c0_10 = arith.constant 0 : index
    %c0_11 = arith.constant 0 : index
    %c0_12 = arith.constant 0 : index
    %16 = vector.load %arg7[%c0_10, %c0_11, %c0_12] : memref<1x8x8xi8, #tpu.memory_space<vmem>>, vector<1x8x8xi8>
    %17 = vector.shape_cast %16 : vector<1x8x8xi8> to vector<8x8xi8>
    %c0_i8 = arith.constant 0 : i8
    %18 = vector.broadcast %c0_i8 : i8 to vector<8x8xi8>
    %19 = arith.cmpi ne, %17, %18 : vector<8x8xi8>
    %20 = vector.extract_strided_slice %15 {offsets = [0, 0], sizes = [8, 32], strides = [1, 1]} : vector<8x64xf32> to vector<8x32xf32>
    %21 = vector.extract_strided_slice %15 {offsets = [0, 32], sizes = [8, 32], strides = [1, 1]} : vector<8x64xf32> to vector<8x32xf32>
    %22 = vector.extract_strided_slice %10 {offsets = [0, 0], sizes = [8, 8], strides = [1, 1]} : vector<8x32xf32> to vector<8x8xf32>
    %23 = vector.extract_strided_slice %20 {offsets = [0, 0], sizes = [8, 8], strides = [1, 1]} : vector<8x32xf32> to vector<8x8xf32>
    %24 = vector.extract_strided_slice %21 {offsets = [0, 0], sizes = [8, 8], strides = [1, 1]} : vector<8x32xf32> to vector<8x8xf32>
    %cst_13 = arith.constant dense<0.000000e+00> : vector<8x8xf32>
    %25 = tpu.matmul %22, %23, %cst_13 {dimension_numbers = #tpu.dot_dimension_numbers<[1], [1], [0], [0], [0, 0, 1, 0], [], []>} : vector<8x8xf32>, vector<8x8xf32>, vector<8x8xf32> -> vector<8x8xf32>
    %cst_14 = arith.constant 0.353553385 : f32
    %26 = vector.broadcast %cst_14 : f32 to vector<8x8xf32>
    %27 = arith.mulf %25, %26 : vector<8x8xf32>
    %cst_15 = arith.constant -1.000000e+09 : f32
    %28 = vector.broadcast %cst_15 : f32 to vector<8x8xf32>
    %29 = arith.select %19, %28, %27 : vector<8x8xi1>, vector<8x8xf32>
    %cst_16 = arith.constant dense<0xFF800000> : vector<8xf32>
    %30 = vector.multi_reduction <maximumf>, %29, %cst_16 [1] : vector<8x8xf32> to vector<8xf32>
    %31 = vector.shape_cast %30 : vector<8xf32> to vector<8x1xf32>
    %32 = vector.broadcast %31 : vector<8x1xf32> to vector<8x8xf32>
    %33 = arith.subf %29, %32 : vector<8x8xf32>
    %34 = math.exp %33 : vector<8x8xf32>
    %cst_17 = arith.constant dense<0.000000e+00> : vector<8xf32>
    %35 = vector.multi_reduction <add>, %34, %cst_17 [1] : vector<8x8xf32> to vector<8xf32>
    %36 = vector.shape_cast %35 : vector<8xf32> to vector<8x1xf32>
    %37 = tpu.reciprocal %36 {approx = true} : vector<8x1xf32> -> vector<8x1xf32>
    %38 = vector.broadcast %37 : vector<8x1xf32> to vector<8x8xf32>
    %39 = arith.mulf %34, %38 : vector<8x8xf32>
    %c0_18 = arith.constant 0 : index
    %c0_19 = arith.constant 0 : index
    %c0_20 = arith.constant 0 : index
    %c0_21 = arith.constant 0 : index
    %40 = vector.load %arg11[%c0_18, %c0_19, %c0_20, %c0_21] : memref<1x4x8x8xf32, #tpu.memory_space<vmem>>, vector<1x1x8x8xf32>
    %41 = vector.shape_cast %40 : vector<1x1x8x8xf32> to vector<8x8xf32>
    %42 = vector.shape_cast %39 : vector<8x8xf32> to vector<1x1x8x8xf32>
    tpu.vector_store %arg11[%c0_18, %c0_19, %c0_20, %c0_21], %42 {strides = array<i32>} : memref<1x4x8x8xf32, #tpu.memory_space<vmem>>, vector<1x1x8x8xf32>,
    %cst_22 = arith.constant dense<0.000000e+00> : vector<8x8xf32>
    %43 = tpu.matmul %39, %24, %cst_22 {dimension_numbers = #tpu.dot_dimension_numbers<[1], [0], [0], [1], [0, 0, 1, 1], [], []>} : vector<8x8xf32>, vector<8x8xf32>, vector<8x8xf32> -> vector<8x8xf32>
    %44 = vector.extract_strided_slice %10 {offsets = [0, 8], sizes = [8, 8], strides = [1, 1]} : vector<8x32xf32> to vector<8x8xf32>
    %45 = vector.extract_strided_slice %20 {offsets = [0, 8], sizes = [8, 8], strides = [1, 1]} : vector<8x32xf32> to vector<8x8xf32>
    %46 = vector.extract_strided_slice %21 {offsets = [0, 8], sizes = [8, 8], strides = [1, 1]} : vector<8x32xf32> to vector<8x8xf32>
    %cst_23 = arith.constant dense<0.000000e+00> : vector<8x8xf32>
    %47 = tpu.matmul %44, %45, %cst_23 {dimension_numbers = #tpu.dot_dimension_numbers<[1], [1], [0], [0], [0, 0, 1, 0], [], []>} : vector<8x8xf32>, vector<8x8xf32>, vector<8x8xf32> -> vector<8x8xf32>
    %cst_24 = arith.constant 0.353553385 : f32
    %48 = vector.broadcast %cst_24 : f32 to vector<8x8xf32>
    %49 = arith.mulf %47, %48 : vector<8x8xf32>
    %cst_25 = arith.constant -1.000000e+09 : f32
    %50 = vector.broadcast %cst_25 : f32 to vector<8x8xf32>
    %51 = arith.select %19, %50, %49 : vector<8x8xi1>, vector<8x8xf32>
    %cst_26 = arith.constant dense<0xFF800000> : vector<8xf32>
    %52 = vector.multi_reduction <maximumf>, %51, %cst_26 [1] : vector<8x8xf32> to vector<8xf32>
    %53 = vector.shape_cast %52 : vector<8xf32> to vector<8x1xf32>
    %54 = vector.broadcast %53 : vector<8x1xf32> to vector<8x8xf32>
    %55 = arith.subf %51, %54 : vector<8x8xf32>
    %56 = math.exp %55 : vector<8x8xf32>
    %cst_27 = arith.constant dense<0.000000e+00> : vector<8xf32>
    %57 = vector.multi_reduction <add>, %56, %cst_27 [1] : vector<8x8xf32> to vector<8xf32>
    %58 = vector.shape_cast %57 : vector<8xf32> to vector<8x1xf32>
    %59 = tpu.reciprocal %58 {approx = true} : vector<8x1xf32> -> vector<8x1xf32>
    %60 = vector.broadcast %59 : vector<8x1xf32> to vector<8x8xf32>
    %61 = arith.mulf %56, %60 : vector<8x8xf32>
    %c0_28 = arith.constant 0 : index
    %c1 = arith.constant 1 : index
    %c0_29 = arith.constant 0 : index
    %c0_30 = arith.constant 0 : index
    %62 = vector.load %arg11[%c0_28, %c1, %c0_29, %c0_30] : memref<1x4x8x8xf32, #tpu.memory_space<vmem>>, vector<1x1x8x8xf32>
    %63 = vector.shape_cast %62 : vector<1x1x8x8xf32> to vector<8x8xf32>
    %64 = vector.shape_cast %61 : vector<8x8xf32> to vector<1x1x8x8xf32>
    tpu.vector_store %arg11[%c0_28, %c1, %c0_29, %c0_30], %64 {strides = array<i32>} : memref<1x4x8x8xf32, #tpu.memory_space<vmem>>, vector<1x1x8x8xf32>,
    %cst_31 = arith.constant dense<0.000000e+00> : vector<8x8xf32>
    %65 = tpu.matmul %61, %46, %cst_31 {dimension_numbers = #tpu.dot_dimension_numbers<[1], [0], [0], [1], [0, 0, 1, 1], [], []>} : vector<8x8xf32>, vector<8x8xf32>, vector<8x8xf32> -> vector<8x8xf32>
    %66 = vector.extract_strided_slice %10 {offsets = [0, 16], sizes = [8, 8], strides = [1, 1]} : vector<8x32xf32> to vector<8x8xf32>
    %67 = vector.extract_strided_slice %20 {offsets = [0, 16], sizes = [8, 8], strides = [1, 1]} : vector<8x32xf32> to vector<8x8xf32>
    %68 = vector.extract_strided_slice %21 {offsets = [0, 16], sizes = [8, 8], strides = [1, 1]} : vector<8x32xf32> to vector<8x8xf32>
    %cst_32 = arith.constant dense<0.000000e+00> : vector<8x8xf32>
    %69 = tpu.matmul %66, %67, %cst_32 {dimension_numbers = #tpu.dot_dimension_numbers<[1], [1], [0], [0], [0, 0, 1, 0], [], []>} : vector<8x8xf32>, vector<8x8xf32>, vector<8x8xf32> -> vector<8x8xf32>
    %cst_33 = arith.constant 0.353553385 : f32
    %70 = vector.broadcast %cst_33 : f32 to vector<8x8xf32>
    %71 = arith.mulf %69, %70 : vector<8x8xf32>
    %cst_34 = arith.constant -1.000000e+09 : f32
    %72 = vector.broadcast %cst_34 : f32 to vector<8x8xf32>
    %73 = arith.select %19, %72, %71 : vector<8x8xi1>, vector<8x8xf32>
    %cst_35 = arith.constant dense<0xFF800000> : vector<8xf32>
    %74 = vector.multi_reduction <maximumf>, %73, %cst_35 [1] : vector<8x8xf32> to vector<8xf32>
    %75 = vector.shape_cast %74 : vector<8xf32> to vector<8x1xf32>
    %76 = vector.broadcast %75 : vector<8x1xf32> to vector<8x8xf32>
    %77 = arith.subf %73, %76 : vector<8x8xf32>
    %78 = math.exp %77 : vector<8x8xf32>
    %cst_36 = arith.constant dense<0.000000e+00> : vector<8xf32>
    %79 = vector.multi_reduction <add>, %78, %cst_36 [1] : vector<8x8xf32> to vector<8xf32>
    %80 = vector.shape_cast %79 : vector<8xf32> to vector<8x1xf32>
    %81 = tpu.reciprocal %80 {approx = true} : vector<8x1xf32> -> vector<8x1xf32>
    %82 = vector.broadcast %81 : vector<8x1xf32> to vector<8x8xf32>
    %83 = arith.mulf %78, %82 : vector<8x8xf32>
    %c0_37 = arith.constant 0 : index
    %c2 = arith.constant 2 : index
    %c0_38 = arith.constant 0 : index
    %c0_39 = arith.constant 0 : index
    %84 = vector.load %arg11[%c0_37, %c2, %c0_38, %c0_39] : memref<1x4x8x8xf32, #tpu.memory_space<vmem>>, vector<1x1x8x8xf32>
    %85 = vector.shape_cast %84 : vector<1x1x8x8xf32> to vector<8x8xf32>
    %86 = vector.shape_cast %83 : vector<8x8xf32> to vector<1x1x8x8xf32>
    tpu.vector_store %arg11[%c0_37, %c2, %c0_38, %c0_39], %86 {strides = array<i32>} : memref<1x4x8x8xf32, #tpu.memory_space<vmem>>, vector<1x1x8x8xf32>,
    %cst_40 = arith.constant dense<0.000000e+00> : vector<8x8xf32>
    %87 = tpu.matmul %83, %68, %cst_40 {dimension_numbers = #tpu.dot_dimension_numbers<[1], [0], [0], [1], [0, 0, 1, 1], [], []>} : vector<8x8xf32>, vector<8x8xf32>, vector<8x8xf32> -> vector<8x8xf32>
    %88 = vector.extract_strided_slice %10 {offsets = [0, 24], sizes = [8, 8], strides = [1, 1]} : vector<8x32xf32> to vector<8x8xf32>
    %89 = vector.extract_strided_slice %20 {offsets = [0, 24], sizes = [8, 8], strides = [1, 1]} : vector<8x32xf32> to vector<8x8xf32>
    %90 = vector.extract_strided_slice %21 {offsets = [0, 24], sizes = [8, 8], strides = [1, 1]} : vector<8x32xf32> to vector<8x8xf32>
    %cst_41 = arith.constant dense<0.000000e+00> : vector<8x8xf32>
    %91 = tpu.matmul %88, %89, %cst_41 {dimension_numbers = #tpu.dot_dimension_numbers<[1], [1], [0], [0], [0, 0, 1, 0], [], []>} : vector<8x8xf32>, vector<8x8xf32>, vector<8x8xf32> -> vector<8x8xf32>
    %cst_42 = arith.constant 0.353553385 : f32
    %92 = vector.broadcast %cst_42 : f32 to vector<8x8xf32>
    %93 = arith.mulf %91, %92 : vector<8x8xf32>
    %cst_43 = arith.constant -1.000000e+09 : f32
    %94 = vector.broadcast %cst_43 : f32 to vector<8x8xf32>
    %95 = arith.select %19, %94, %93 : vector<8x8xi1>, vector<8x8xf32>
    %cst_44 = arith.constant dense<0xFF800000> : vector<8xf32>
    %96 = vector.multi_reduction <maximumf>, %95, %cst_44 [1] : vector<8x8xf32> to vector<8xf32>
    %97 = vector.shape_cast %96 : vector<8xf32> to vector<8x1xf32>
    %98 = vector.broadcast %97 : vector<8x1xf32> to vector<8x8xf32>
    %99 = arith.subf %95, %98 : vector<8x8xf32>
    %100 = math.exp %99 : vector<8x8xf32>
    %cst_45 = arith.constant dense<0.000000e+00> : vector<8xf32>
    %101 = vector.multi_reduction <add>, %100, %cst_45 [1] : vector<8x8xf32> to vector<8xf32>
    %102 = vector.shape_cast %101 : vector<8xf32> to vector<8x1xf32>
    %103 = tpu.reciprocal %102 {approx = true} : vector<8x1xf32> -> vector<8x1xf32>
    %104 = vector.broadcast %103 : vector<8x1xf32> to vector<8x8xf32>
    %105 = arith.mulf %100, %104 : vector<8x8xf32>
    %c0_46 = arith.constant 0 : index
    %c3 = arith.constant 3 : index
    %c0_47 = arith.constant 0 : index
    %c0_48 = arith.constant 0 : index
    %106 = vector.load %arg11[%c0_46, %c3, %c0_47, %c0_48] : memref<1x4x8x8xf32, #tpu.memory_space<vmem>>, vector<1x1x8x8xf32>
    %107 = vector.shape_cast %106 : vector<1x1x8x8xf32> to vector<8x8xf32>
    %108 = vector.shape_cast %105 : vector<8x8xf32> to vector<1x1x8x8xf32>
    tpu.vector_store %arg11[%c0_46, %c3, %c0_47, %c0_48], %108 {strides = array<i32>} : memref<1x4x8x8xf32, #tpu.memory_space<vmem>>, vector<1x1x8x8xf32>,
    %cst_49 = arith.constant dense<0.000000e+00> : vector<8x8xf32>
    %109 = tpu.matmul %105, %90, %cst_49 {dimension_numbers = #tpu.dot_dimension_numbers<[1], [0], [0], [1], [0, 0, 1, 1], [], []>} : vector<8x8xf32>, vector<8x8xf32>, vector<8x8xf32> -> vector<8x8xf32>
    %110 = tpu.concatenate %43, %65, %87, %109 in 1 : vector<8x8xf32>, vector<8x8xf32>, vector<8x8xf32>, vector<8x8xf32> -> vector<8x32xf32>
    %c0_50 = arith.constant 0 : index
    %c0_51 = arith.constant 0 : index
    %111 = vector.load %arg5[%c0_50, %c0_51] : memref<32x32xf32, #tpu.memory_space<vmem>>, vector<32x32xf32>
    %cst_52 = arith.constant dense<0.000000e+00> : vector<8x32xf32>
    %112 = tpu.matmul %110, %111, %cst_52 {dimension_numbers = #tpu.dot_dimension_numbers<[1], [0], [0], [1], [0, 0, 1, 1], [], []>} : vector<8x32xf32>, vector<32x32xf32>, vector<8x32xf32> -> vector<8x32xf32>
    %c0_53 = arith.constant 0 : index
    %c0_54 = arith.constant 0 : index
    %113 = vector.load %arg6[%c0_53, %c0_54] : memref<1x32xf32, #tpu.memory_space<vmem>>, vector<1x32xf32>
    %114 = vector.broadcast %113 : vector<1x32xf32> to vector<8x32xf32>
    %115 = arith.addf %112, %114 : vector<8x32xf32>
    %c0_55 = arith.constant 0 : index
    %c0_56 = arith.constant 0 : index
    %116 = vector.load %arg8[%c0_55, %c0_56] : memref<1x32xf32, #tpu.memory_space<vmem>>, vector<1x32xf32>
    %c0_57 = arith.constant 0 : index
    %c0_58 = arith.constant 0 : index
    %117 = vector.load %arg9[%c0_57, %c0_58] : memref<1x32xf32, #tpu.memory_space<vmem>>, vector<1x32xf32>
    %118 = arith.addf %1, %115 : vector<8x32xf32>
    %cst_59 = arith.constant dense<0.000000e+00> : vector<8xf32>
    %119 = vector.multi_reduction <add>, %118, %cst_59 [1] : vector<8x32xf32> to vector<8xf32>
    %120 = vector.shape_cast %119 : vector<8xf32> to vector<8x1xf32>
    %cst_60 = arith.constant 3.200000e+01 : f32
    %121 = vector.broadcast %cst_60 : f32 to vector<8x1xf32>
    %122 = arith.divf %120, %121 : vector<8x1xf32>
    %123 = vector.broadcast %122 : vector<8x1xf32> to vector<8x32xf32>
    %124 = arith.subf %118, %123 : vector<8x32xf32>
    %125 = arith.mulf %124, %124 : vector<8x32xf32>
    %cst_61 = arith.constant dense<0.000000e+00> : vector<8xf32>
    %126 = vector.multi_reduction <add>, %125, %cst_61 [1] : vector<8x32xf32> to vector<8xf32>
    %127 = vector.shape_cast %126 : vector<8xf32> to vector<8x1xf32>
    %cst_62 = arith.constant 3.200000e+01 : f32
    %128 = vector.broadcast %cst_62 : f32 to vector<8x1xf32>
    %129 = arith.divf %127, %128 : vector<8x1xf32>
    %130 = vector.broadcast %122 : vector<8x1xf32> to vector<8x32xf32>
    %131 = arith.subf %118, %130 : vector<8x32xf32>
    %cst_63 = arith.constant 9.99999996E-13 : f32
    %132 = vector.broadcast %cst_63 : f32 to vector<8x1xf32>
    %133 = arith.addf %129, %132 : vector<8x1xf32>
    %134 = math.rsqrt %133 : vector<8x1xf32>
    %135 = vector.broadcast %134 : vector<8x1xf32> to vector<8x32xf32>
    %136 = arith.mulf %131, %135 : vector<8x32xf32>
    %137 = vector.broadcast %116 : vector<1x32xf32> to vector<8x32xf32>
    %138 = arith.mulf %136, %137 : vector<8x32xf32>
    %139 = vector.broadcast %117 : vector<1x32xf32> to vector<8x32xf32>
    %140 = arith.addf %138, %139 : vector<8x32xf32>
    %c0_64 = arith.constant 0 : index
    %c0_65 = arith.constant 0 : index
    %c0_66 = arith.constant 0 : index
    %141 = vector.load %arg10[%c0_64, %c0_65, %c0_66] : memref<1x8x32xf32, #tpu.memory_space<vmem>>, vector<1x8x32xf32>
    %142 = vector.shape_cast %141 : vector<1x8x32xf32> to vector<8x32xf32>
    %143 = vector.shape_cast %140 : vector<8x32xf32> to vector<1x8x32xf32>
    tpu.vector_store %arg10[%c0_64, %c0_65, %c0_66], %143 {strides = array<i32>} : memref<1x8x32xf32, #tpu.memory_space<vmem>>, vector<1x8x32xf32>,
    return
  }
  func.func @transform_0(%arg0: i32) -> (i32, i32, i32) {
    %c0_i32 = arith.constant 0 : i32
    %c0_i32_0 = arith.constant 0 : i32
    %c0_i32_1 = arith.constant 0 : i32
    return %arg0, %c0_i32, %c0_i32_0 : i32, i32, i32
  }
  func.func @transform_1(%arg0: i32) -> (i32, i32, i32) {
    %c0_i32 = arith.constant 0 : i32
    %c0_i32_0 = arith.constant 0 : i32
    %c0_i32_1 = arith.constant 0 : i32
    return %arg0, %c0_i32, %c0_i32_0 : i32, i32, i32
  }
  func.func @transform_2(%arg0: i32) -> (i32, i32) {
    %c0_i32 = arith.constant 0 : i32
    %c0_i32_0 = arith.constant 0 : i32
    %c0_i32_1 = arith.constant 0 : i32
    return %c0_i32, %c0_i32_0 : i32, i32
  }
  func.func @transform_3(%arg0: i32) -> (i32, i32) {
    %c0_i32 = arith.constant 0 : i32
    %c0_i32_0 = arith.constant 0 : i32
    %c0_i32_1 = arith.constant 0 : i32
    return %c0_i32, %c0_i32_0 : i32, i32
  }
  func.func @transform_4(%arg0: i32) -> (i32, i32) {
    %c0_i32 = arith.constant 0 : i32
    %c0_i32_0 = arith.constant 0 : i32
    %c0_i32_1 = arith.constant 0 : i32
    return %c0_i32, %c0_i32_0 : i32, i32
  }
  func.func @transform_5(%arg0: i32) -> (i32, i32) {
    %c0_i32 = arith.constant 0 : i32
    %c0_i32_0 = arith.constant 0 : i32
    %c0_i32_1 = arith.constant 0 : i32
    return %c0_i32, %c0_i32_0 : i32, i32
  }
  func.func @transform_6(%arg0: i32) -> (i32, i32, i32) {
    %c0_i32 = arith.constant 0 : i32
    %c0_i32_0 = arith.constant 0 : i32
    %c0_i32_1 = arith.constant 0 : i32
    return %arg0, %c0_i32, %c0_i32_0 : i32, i32, i32
  }
  func.func @transform_7(%arg0: i32) -> (i32, i32) {
    %c0_i32 = arith.constant 0 : i32
    %c0_i32_0 = arith.constant 0 : i32
    %c0_i32_1 = arith.constant 0 : i32
    return %c0_i32, %c0_i32_0 : i32, i32
  }
  func.func @transform_8(%arg0: i32) -> (i32, i32) {
    %c0_i32 = arith.constant 0 : i32
    %c0_i32_0 = arith.constant 0 : i32
    %c0_i32_1 = arith.constant 0 : i32
    return %c0_i32, %c0_i32_0 : i32, i32
  }
  func.func @transform_9(%arg0: i32) -> (i32, i32, i32) {
    %c0_i32 = arith.constant 0 : i32
    %c0_i32_0 = arith.constant 0 : i32
    %c0_i32_1 = arith.constant 0 : i32
    return %arg0, %c0_i32, %c0_i32_0 : i32, i32, i32
  }
  func.func @transform_10(%arg0: i32) -> (i32, i32, i32, i32) {
    %c0_i32 = arith.constant 0 : i32
    %c0_i32_0 = arith.constant 0 : i32
    %c0_i32_1 = arith.constant 0 : i32
    %c0_i32_2 = arith.constant 0 : i32
    return %arg0, %c0_i32, %c0_i32_0, %c0_i32_1 : i32, i32, i32, i32
  }
}

</mosaic_0001>

<bundles_post_ra>
// kernel: _lambda_.19
= control target key start
LH: loop header
LB: loop body
LE: loop exit
PB: predicated region body
PF: predicated region fallthrough
CT: control target
= control target key end

     0   :  { %vm40_vm0 = vcmask 261120   ;;  %s536_s0 = inlined_call_operand.vmem [shape: f32[16,32], index: 0, kind: input, shape index: {}]   ;;  %s537_s1 = inlined_call_operand.vmem [shape: f32[32,64], index: 1, kind: input, shape index: {}]   ;;  %s538_s2 = inlined_call_operand.vmem [shape: f32[1,64], index: 2, kind: input, shape index: {}]   ;;  %s539_s3 = inlined_call_operand.vmem [shape: f32[64,32], index: 3, kind: input, shape index: {}]   ;;  %s540_s4 = inlined_call_operand.vmem [shape: f32[1,32], index: 4, kind: input, shape index: {}, may-alias: {4,6}]   ;;  %s541_s5 = inlined_call_operand.vmem [shape: f32[1,32], index: 5, kind: input, shape index: {}]   ;;  %s542_s6 = inlined_call_operand.vmem [shape: f32[1,32], index: 6, kind: input, shape index: {}, may-alias: {4,6}]   ;;  %s543_s7 = inlined_call_operand.hbm [shape: f32[16,32], index: 7, kind: output, shape index: {}]  }
   0x1   :  { %v29_v0 = vld [vmem:[%s537_s1] sm:$0xff]  ;;  %v30_v1 = vld [vmem:[%s537_s1 + $0x8] sm:$0xff]  ;;  %v31_v2 = vld [vmem:[%s537_s1 + $0x10] sm:$0xff] }
   0x2   :  { %v356_v3 = vpack.c.bf16 %v30_v1, %v29_v0  ;;  %v32_v4 = vld [vmem:[%s537_s1 + $0x18] sm:$0xff]  ;;  %v473_v5 = vld [vmem:[%s536_s0] sm:$0xff] }
   0x3   :  { %v360_v6 = vpack.c.bf16 %v32_v4, %v31_v2  ;;  %334 = vmatprep.mubr.msk.f32.mxu0 %vm40_vm0, %v473_v5 }
   0x4   :  { %12 = vsyncpa [#allocation3], 0  ;;  %357 = vmatprep.subr.bf16.mxu0 %v356_v3  ;;  %v28_v7 = vld [vmem:[%s536_s0 + $0x8] sm:$0xff]  ;;  %v140_v8 = vld [vmem:[%s539_s3] sm:$0xff]  ;;  %vm155_vm1 = vcmask 523264   ;;  %s415_s9 = smov [#allocation2]  }
   0x5   :  { %359 = vmatpush3.bf16.msra.mxu0 %v356_v3  ;;  %v141_v9 = vld [vmem:[%s539_s3 + $0x8] sm:$0xff]  ;;  %v142_v10 = vld [vmem:[%s539_s3 + $0x10] sm:$0xff]  ;;  %v143_v12 = vld [vmem:[%s539_s3 + $0x18] sm:$0xff]  ;;  %s291_s10 = sshll.u32 %s415_s9, 4  ;;  %s292_s10 = int_to_ptr.vmem [resolvable:$true] %s291_s10 }
   0x6   :  { %361 = vmatprep.subr.bf16.mxu0 %v360_v6  ;;  %v364_v11 = vpack.c.bf16 %v141_v9, %v140_v8  ;;  %v368_v13 = vpack.c.bf16 %v143_v12, %v142_v10  ;;  %v144_v14 = vld [vmem:[%s539_s3 + $0x20] sm:$0xff]  ;;  %v145_v15 = vld [vmem:[%s539_s3 + $0x28] sm:$0xff]  ;;  %v146_v17 = vld [vmem:[%s539_s3 + $0x30] sm:$0xff]  ;;  %s391_s11 = scalar_lea.vmem %s292_s10, 256  ;;  %p396_p1 = scmp.lt.s32.totalorder %s292_s10, %s292_s10 }
   0x7   :  { %v372_v16 = vpack.c.bf16 %v145_v15, %v144_v14  ;;  %v147_v18 = vld [vmem:[%s539_s3 + $0x38] sm:$0xff]  ;;  %v302_v20 = vld [vmem:[%s538_s2] ss:$0 sm:$0xff]  ;;  %p392_p0 = scmp.ne.s32.totalorder %s292_s10, %s391_s11  ;;  %p397_p2 = scmp.lt.s32.totalorder %s391_s11, %s391_s11 }
   0x8   :  { %365 = vmatprep.subr.bf16.mxu1 %v364_v11  ;;  %v376_v19 = vpack.c.bf16 %v147_v18, %v146_v17  ;;  %v305_v43 = vld [vmem:[%s540_s4] ss:$0 sm:$0xff] }
   0x9   :  { %363 = vmatpush3.bf16.msra.mxu0 %v360_v6  ;;  %367 = vmatpush3.bf16.msra.mxu1 %v364_v11  ;;  %p398_p3 = por %p397_p2, %p396_p1 }
   0xa   :  { %369 = vmatprep.subr.bf16.mxu1 %v368_v13 }
   0xb   :  { %p399_p4 = pnand %p398_p3, %p392_p0 }
   0xc   :  { %335 = vmatmul.mubr.msk.f32.vlgmr.msra.gmra.mrb[0].mxu0 %vm40_vm0, %v28_v7 }
   0xd   :  { %371 = vmatpush3.bf16.msra.mxu1 %v368_v13 }
   0xe   :  { %373 = vmatprep.subr.bf16.mxu1 %v372_v16 }
  0x11   :  { %375 = vmatpush3.bf16.msra.mxu1 %v372_v16 }
  0x12   :  { %377 = vmatprep.subr.bf16.mxu1 %v376_v19 }
  0x15   :  { %379 = vmatpush3.bf16.msra.mxu1 %v376_v19 }
  0xdf   :  { %v336_v21 = vpop.f32.mrb[0].mxu0 }
  0xe0   :  { %v119_v22 = vadd.f32 %v336_v21, %v302_v20  ;;  %v113_v23 = vpop.f32.mrb[1].mxu0 }
  0xe1   :  { %v114_v24 = vadd.f32 %v302_v20, %v113_v23 }
  0xe2   :  { %v123_v25 = vmul.f32 %v119_v22, %v119_v22 }
  0xe3   :  { %v122_v26 = vmul.f32 %v114_v24, %v114_v24 }
  0xe4   :  { %v125_v27 = vmul.f32 %v123_v25, %v119_v22 }
  0xe5   :  { %v124_v28 = vmul.f32 %v122_v26, %v114_v24 }
  0xe6   :  { %v127_v29 = vmul.f32 0.044715, %v125_v27 }
  0xe7   :  { %v126_v30 = vmul.f32 0.044715, %v124_v28 }
  0xe8   :  { %v129_v31 = vadd.f32 %v127_v29, %v119_v22 }
  0xe9   :  { %v128_v32 = vadd.f32 %v126_v30, %v114_v24 }
  0xea   :  { %v131_v33 = vmul.f32 0.7978846, %v129_v31 }
  0xeb   :  { %v130_v34 = vmul.f32 0.7978846, %v128_v32 }
  0xec   :  { %383 = vtanh.f32 %v131_v33 }
  0xed   :  { %385 = vtanh.f32 %v130_v34 }
  0xf6   :  { %v384_v35 = vpop.eup %383 }
  0xf7   :  { %v386_v36 = vpop.eup %385  ;;  %v135_v37 = vadd.f32 1.0, %v384_v35 }
  0xf8   :  { %v134_v38 = vadd.f32 1.0, %v386_v36 }
  0xf9   :  { %v137_v39 = vmul.f32 0.5, %v135_v37 }
  0xfa   :  { %v136_v40 = vmul.f32 0.5, %v134_v38 }
  0xfb   :  { %v139_v42 = vmul.f32 %v137_v39, %v119_v22 }
  0xfc   :  { %v138_v41 = vmul.f32 %v136_v40, %v114_v24 }
  0xfe   :  { %353 = vmatprep.mubr.msk.f32.mxu1 %vm155_vm1, %v138_v41 }
  0xff   :  { %354 = vmatmul.mubr.msk.f32.vlgmr.msra.gmra.mrb[0].mxu1 %vm155_vm1, %v139_v42 }
 0x1d2   :  { %v355_v44 = vpop.f32.mrb[0].mxu1 }
 0x1d3   :  { %v228_v45 = vpop.f32.mrb[1].mxu1  ;;  %v234_v46 = vadd.f32 %v355_v44, %v305_v43 }
 0x1d4   :  { %v229_v47 = vadd.f32 %v305_v43, %v228_v45 }
 0x1d5   :  { %v240_v50 = vadd.f32 %v234_v46, %v28_v7  ;;  %v309_v7 = vld [vmem:[%s542_s6] ss:$0 sm:$0xff] }
 0x1d6   :  { %v239_v48 = vadd.f32 %v229_v47, %v473_v5  ;;  %v308_v5 = vld [vmem:[%s541_s5] ss:$0 sm:$0xff] }
 0x1d7   :  { %v244_v51 = vsel %vm40_vm0, %v240_v50, 0.0 }
 0x1d8   :  { %v241_v49 = vsel %vm40_vm0, %v239_v48, 0.0 }
 0x1d9   :  { %242 = vadd.xlane.f32.xlu0 %v241_v49 }
 0x1dd   :  { %245 = vadd.xlane.f32.xlu0 %v244_v51 }
 0x266   :  { %v243_v52 = vpop.xlane.xlu0 %242 }
 0x267   :  { %v248_v53 = vmul.f32 0.03125, %v243_v52 }
 0x269   :  { %v250_v54 = vsub.f32 %v239_v48, %v248_v53 }
 0x26a   :  { %v246_v55 = vpop.xlane.xlu0 %245 }
 0x26b   :  { %v249_v56 = vmul.f32 0.03125, %v246_v55  ;;  %v252_v57 = vmul.f32 %v250_v54, %v250_v54 }
 0x26d   :  { %v251_v58 = vsub.f32 %v240_v50, %v249_v56  ;;  %v254_v59 = vsel %vm40_vm0, %v252_v57, 0.0 }
 0x26e   :  { %255 = vadd.xlane.f32.xlu1 %v254_v59 }
 0x26f   :  { %v253_v60 = vmul.f32 %v251_v58, %v251_v58 }
 0x271   :  { %v257_v61 = vsel %vm40_vm0, %v253_v60, 0.0 }
 0x272   :  { %258 = vadd.xlane.f32.xlu1 %v257_v61 }
 0x2fb   :  { %v256_v62 = vpop.xlane.xlu1 %255 }
 0x2fc   :  { %v260_v63 = vmul.f32 0.03125, %v256_v62 }
 0x2fe   :  { %v262_v0 = vadd.f32 1e-12, %v260_v63 }
 0x2ff   :  { %v259_v1 = vpop.xlane.xlu1 %258 }
 0x300   :  { %387 = vrsqrt.f32 %v262_v0  ;;  %v261_v2 = vmul.f32 0.03125, %v259_v1 }
 0x302   :  { %v263_v3 = vadd.f32 1e-12, %v261_v2 }
 0x304   :  { %389 = vrsqrt.f32 %v263_v3 }
 0x30a   :  { %v388_v4 = vpop.eup %387 }
 0x30b   :  { %v266_v6 = vmul.f32 %v388_v4, %v250_v54 }
 0x30d   :  { %v274_v8 = vmul.f32 %v308_v5, %v266_v6 }
 0x30e   :  { %v390_v9 = vpop.eup %389 }
 0x30f   :  { %v267_v10 = vmul.f32 %v390_v9, %v251_v58  ;;  %v282_v11 = vadd.f32 %v309_v7, %v274_v8 }
 0x311   :  { %v275_v12 = vmul.f32 %v308_v5, %v267_v10  ;;  %284 = vst.msk [vmem:[#allocation2] sm:$0xff] %vm40_vm0, %v282_v11 }
 0x313   :  { %v283_v13 = vadd.f32 %v309_v7, %v275_v12 }
 0x315   :  { %285 = vst.msk [vmem:[#allocation2 + $0x8] sm:$0xff] %vm40_vm0, %v283_v13 }
 0x316   :  { %402 = shalt.err (!%p399_p4)
}
 0x317   :  { %s403_s12 = scalar_lea.hbm %s543_s7, 256 }
 0x318   :  { %p404_p5 = scmp.ne.s32.totalorder %s543_s7, %s403_s12  ;;  %p407_p6 = scmp.lt.u32.totalorder %s403_s12, %s543_s7 }
 0x31a   :  { %p409_p7 = pnand %p407_p6, %p404_p5 }
 0x31c   :  { %412 = shalt.err (!%p409_p7)
}
 0x31d   :  { %s416_s16 = smov 128   ;;  %s417_s17 = smov 8  }
 0x31e   :  { %297 = dma.vmem_to_hbm [thread:$0]  %s292_s10, 256, %s543_s7, [#allocation3], %s416_s16, %s416_s16, %s417_s17  }
 0x31f   :  { %413 = dma.done.wait [#allocation3], 256  }
 0x320   :  { %414 = vsyncadd [#allocation3], 4294967040 }
 0x321   :  { %301 = vsyncpa [#allocation3], 1 }

// kernel: _lambda_.11
= control target key start
LH: loop header
LB: loop body
LE: loop exit
PB: predicated region body
PF: predicated region fallthrough
CT: control target
= control target key end

     0   :  { %vm39_vm0 = vcmask 261120   ;;  %vm154_vm1 = vcmask 523264   ;;  %s487_s1 = inlined_call_operand.vmem [shape: f32[32,64], index: 1, kind: input, shape index: {}]   ;;  %s488_s0 = inlined_call_operand.vmem [shape: f32[16,32], index: 0, kind: input, shape index: {}]   ;;  %s489_s3 = inlined_call_operand.vmem [shape: f32[64,32], index: 3, kind: input, shape index: {}]   ;;  %s490_s2 = inlined_call_operand.vmem [shape: f32[1,64], index: 2, kind: input, shape index: {}]   ;;  %s491_s4 = inlined_call_operand.vmem [shape: f32[1,32], index: 4, kind: input, shape index: {}, may-alias: {4,6}]   ;;  %s492_s5 = inlined_call_operand.vmem [shape: f32[1,32], index: 5, kind: input, shape index: {}]   ;;  %s493_s6 = inlined_call_operand.vmem [shape: f32[1,32], index: 6, kind: input, shape index: {}, may-alias: {4,6}]   ;;  %s494_s7 = inlined_call_operand.vmem [shape: f32[16,32], index: 7, kind: output, shape index: {}]  }
   0x1   :  { %v28_v0 = vld [vmem:[%s487_s1] sm:$0xff]  ;;  %v29_v1 = vld [vmem:[%s487_s1 + $0x8] sm:$0xff]  ;;  %v30_v2 = vld [vmem:[%s487_s1 + $0x10] sm:$0xff] }
   0x2   :  { %v343_v3 = vpack.c.bf16 %v29_v1, %v28_v0  ;;  %v31_v4 = vld [vmem:[%s487_s1 + $0x18] sm:$0xff]  ;;  %v430_v5 = vld [vmem:[%s488_s0] sm:$0xff]  ;;  %v27_v7 = vld [vmem:[%s488_s0 + $0x8] sm:$0xff] }
   0x3   :  { %v347_v6 = vpack.c.bf16 %v31_v4, %v30_v2  ;;  %321 = vmatprep.mubr.msk.f32.mxu0 %vm39_vm0, %v430_v5  ;;  %v139_v8 = vld [vmem:[%s489_s3] sm:$0xff]  ;;  %v140_v9 = vld [vmem:[%s489_s3 + $0x8] sm:$0xff]  ;;  %v141_v10 = vld [vmem:[%s489_s3 + $0x10] sm:$0xff] }
   0x4   :  { %344 = vmatprep.subr.bf16.mxu0 %v343_v3  ;;  %v351_v11 = vpack.c.bf16 %v140_v9, %v139_v8  ;;  %v142_v12 = vld [vmem:[%s489_s3 + $0x18] sm:$0xff]  ;;  %v143_v14 = vld [vmem:[%s489_s3 + $0x20] sm:$0xff]  ;;  %v144_v15 = vld [vmem:[%s489_s3 + $0x28] sm:$0xff] }
   0x5   :  { %346 = vmatpush3.bf16.msra.mxu0 %v343_v3  ;;  %v355_v13 = vpack.c.bf16 %v142_v12, %v141_v10  ;;  %v359_v16 = vpack.c.bf16 %v144_v15, %v143_v14  ;;  %v145_v17 = vld [vmem:[%s489_s3 + $0x30] sm:$0xff]  ;;  %v146_v18 = vld [vmem:[%s489_s3 + $0x38] sm:$0xff]  ;;  %v289_v20 = vld [vmem:[%s490_s2] ss:$0 sm:$0xff] }
   0x6   :  { %348 = vmatprep.subr.bf16.mxu0 %v347_v6  ;;  %352 = vmatprep.subr.bf16.mxu1 %v351_v11  ;;  %v363_v19 = vpack.c.bf16 %v146_v18, %v145_v17  ;;  %v292_v43 = vld [vmem:[%s491_s4] ss:$0 sm:$0xff] }
   0x7   :  { %354 = vmatpush3.bf16.msra.mxu1 %v351_v11 }
   0x8   :  { %356 = vmatprep.subr.bf16.mxu1 %v355_v13 }
   0x9   :  { %350 = vmatpush3.bf16.msra.mxu0 %v347_v6 }
   0xb   :  { %358 = vmatpush3.bf16.msra.mxu1 %v355_v13 }
   0xc   :  { %322 = vmatmul.mubr.msk.f32.vlgmr.msra.gmra.mrb[0].mxu0 %vm39_vm0, %v27_v7  ;;  %360 = vmatprep.subr.bf16.mxu1 %v359_v16 }
   0xf   :  { %362 = vmatpush3.bf16.msra.mxu1 %v359_v16 }
  0x10   :  { %364 = vmatprep.subr.bf16.mxu1 %v363_v19 }
  0x13   :  { %366 = vmatpush3.bf16.msra.mxu1 %v363_v19 }
  0xdf   :  { %v323_v21 = vpop.f32.mrb[0].mxu0 }
  0xe0   :  { %v118_v22 = vadd.f32 %v323_v21, %v289_v20  ;;  %v112_v23 = vpop.f32.mrb[1].mxu0 }
  0xe1   :  { %v113_v24 = vadd.f32 %v289_v20, %v112_v23 }
  0xe2   :  { %v122_v25 = vmul.f32 %v118_v22, %v118_v22 }
  0xe3   :  { %v121_v26 = vmul.f32 %v113_v24, %v113_v24 }
  0xe4   :  { %v124_v27 = vmul.f32 %v122_v25, %v118_v22 }
  0xe5   :  { %v123_v28 = vmul.f32 %v121_v26, %v113_v24 }
  0xe6   :  { %v126_v29 = vmul.f32 0.044715, %v124_v27 }
  0xe7   :  { %v125_v30 = vmul.f32 0.044715, %v123_v28 }
  0xe8   :  { %v128_v31 = vadd.f32 %v126_v29, %v118_v22 }
  0xe9   :  { %v127_v32 = vadd.f32 %v125_v30, %v113_v24 }
  0xea   :  { %v130_v33 = vmul.f32 0.7978846, %v128_v31 }
  0xeb   :  { %v129_v34 = vmul.f32 0.7978846, %v127_v32 }
  0xec   :  { %367 = vtanh.f32 %v130_v33 }
  0xed   :  { %369 = vtanh.f32 %v129_v34 }
  0xf6   :  { %v368_v35 = vpop.eup %367 }
  0xf7   :  { %v370_v36 = vpop.eup %369  ;;  %v134_v37 = vadd.f32 1.0, %v368_v35 }
  0xf8   :  { %v133_v38 = vadd.f32 1.0, %v370_v36 }
  0xf9   :  { %v136_v39 = vmul.f32 0.5, %v134_v37 }
  0xfa   :  { %v135_v40 = vmul.f32 0.5, %v133_v38 }
  0xfb   :  { %v138_v42 = vmul.f32 %v136_v39, %v118_v22 }
  0xfc   :  { %v137_v41 = vmul.f32 %v135_v40, %v113_v24 }
  0xfe   :  { %340 = vmatprep.mubr.msk.f32.mxu1 %vm154_vm1, %v137_v41 }
  0xff   :  { %341 = vmatmul.mubr.msk.f32.vlgmr.msra.gmra.mrb[0].mxu1 %vm154_vm1, %v138_v42 }
 0x1d2   :  { %v342_v44 = vpop.f32.mrb[0].mxu1 }
 0x1d3   :  { %v227_v45 = vpop.f32.mrb[1].mxu1  ;;  %v233_v46 = vadd.f32 %v342_v44, %v292_v43 }
 0x1d4   :  { %v228_v47 = vadd.f32 %v292_v43, %v227_v45 }
 0x1d5   :  { %v239_v50 = vadd.f32 %v233_v46, %v27_v7  ;;  %v296_v7 = vld [vmem:[%s493_s6] ss:$0 sm:$0xff] }
 0x1d6   :  { %v238_v48 = vadd.f32 %v228_v47, %v430_v5  ;;  %v295_v5 = vld [vmem:[%s492_s5] ss:$0 sm:$0xff] }
 0x1d7   :  { %v243_v51 = vsel %vm39_vm0, %v239_v50, 0.0 }
 0x1d8   :  { %v240_v49 = vsel %vm39_vm0, %v238_v48, 0.0 }
 0x1d9   :  { %241 = vadd.xlane.f32.xlu0 %v240_v49 }
 0x1dd   :  { %244 = vadd.xlane.f32.xlu0 %v243_v51 }
 0x266   :  { %v242_v52 = vpop.xlane.xlu0 %241 }
 0x267   :  { %v247_v53 = vmul.f32 0.03125, %v242_v52 }
 0x269   :  { %v249_v54 = vsub.f32 %v238_v48, %v247_v53 }
 0x26a   :  { %v245_v55 = vpop.xlane.xlu0 %244 }
 0x26b   :  { %v248_v56 = vmul.f32 0.03125, %v245_v55  ;;  %v251_v57 = vmul.f32 %v249_v54, %v249_v54 }
 0x26d   :  { %v250_v58 = vsub.f32 %v239_v50, %v248_v56  ;;  %v253_v59 = vsel %vm39_vm0, %v251_v57, 0.0 }
 0x26e   :  { %254 = vadd.xlane.f32.xlu1 %v253_v59 }
 0x26f   :  { %v252_v60 = vmul.f32 %v250_v58, %v250_v58 }
 0x271   :  { %v256_v61 = vsel %vm39_vm0, %v252_v60, 0.0 }
 0x272   :  { %257 = vadd.xlane.f32.xlu1 %v256_v61 }
 0x2fb   :  { %v255_v62 = vpop.xlane.xlu1 %254 }
 0x2fc   :  { %v259_v63 = vmul.f32 0.03125, %v255_v62 }
 0x2fe   :  { %v261_v0 = vadd.f32 1e-12, %v259_v63 }
 0x2ff   :  { %v258_v1 = vpop.xlane.xlu1 %257 }
 0x300   :  { %371 = vrsqrt.f32 %v261_v0  ;;  %v260_v2 = vmul.f32 0.03125, %v258_v1 }
 0x302   :  { %v262_v3 = vadd.f32 1e-12, %v260_v2 }
 0x304   :  { %373 = vrsqrt.f32 %v262_v3 }
 0x30a   :  { %v372_v4 = vpop.eup %371 }
 0x30b   :  { %v265_v6 = vmul.f32 %v372_v4, %v249_v54 }
 0x30d   :  { %v273_v8 = vmul.f32 %v295_v5, %v265_v6 }
 0x30e   :  { %v374_v9 = vpop.eup %373 }
 0x30f   :  { %v281_v10 = vadd.f32 %v296_v7, %v273_v8  ;;  %v266_v11 = vmul.f32 %v374_v9, %v250_v58 }
 0x311   :  { %283 = vst.msk [vmem:[%s494_s7] sm:$0xff] %vm39_vm0, %v281_v10  ;;  %v274_v12 = vmul.f32 %v295_v5, %v266_v11 }
 0x313   :  { %v282_v13 = vadd.f32 %v296_v7, %v274_v12 }
 0x315   :  { %284 = vst.msk [vmem:[%s494_s7 + $0x8] sm:$0xff] %vm39_vm0, %v282_v13 }

// kernel: _lambda_.14
= control target key start
LH: loop header
LB: loop body
LE: loop exit
PB: predicated region body
PF: predicated region fallthrough
CT: control target
= control target key end

     0   :  { %15 = vsyncpa [#allocation3], 0  ;;  %s1982_s0 = inlined_call_operand.vmem [shape: f32[2,8,32], index: 0, kind: input, shape index: {}]   ;;  %s1983_s1 = inlined_call_operand.vmem [shape: f32[32,96], index: 1, kind: input, shape index: {}]   ;;  %s1984_s2 = inlined_call_operand.vmem [shape: f32[1,96], index: 2, kind: input, shape index: {}]   ;;  %s1985_s3 = inlined_call_operand.vmem [shape: f32[32,32], index: 3, kind: input, shape index: {}]   ;;  %s1986_s4 = inlined_call_operand.vmem [shape: f32[1,32], index: 4, kind: input, shape index: {}, may-alias: {4,7}]   ;;  %s1987_s5 = inlined_call_operand.vmem [shape: s8[2,8,8], index: 5, kind: input, shape index: {}]   ;;  %s1988_s6 = inlined_call_operand.vmem [shape: f32[1,32], index: 6, kind: input, shape index: {}]   ;;  %s1989_s7 = inlined_call_operand.vmem [shape: f32[1,32], index: 7, kind: input, shape index: {}, may-alias: {4,7}]   ;;  %s1990_s8 = inlined_call_operand.vmem [shape: f32[2,8,32], index: 8, kind: output, shape index: {0}]   ;;  %s1991_s9 = inlined_call_operand.hbm [shape: f32[2,4,8,8], index: 9, kind: output, shape index: {1}]  }
   0x1   :  { %17 = vsyncpa [#allocation3 + $0x1], 0  ;;  %s1721_s30 = smov 0   ;;  %s1723_s10 = smov 0  }
   0x2   :  { %s1725_s11 = smov 0   ;;  %s1727_s12 = smov 0  }
   0x3 LB: > { %s1742_s13 = sadd.s32 4294967295, %s1649_s12   ;;  %s1376_s14 = sadd.s32 4294967294, %s1649_s12   ;;  %s1649_s12 = sphi %s1727_s12, %s2001_s12   ;;  %s1645_s11 = sphi %s1725_s11, %s2000_s11   ;;  %s1641_s10 = sphi %s1723_s10, %s1999_s10   ;;  %s1637_s30 = sphi %s1721_s30, %s1998_s30  }
   0x4   : > { %s1746_s15 = sadd.s32 1, %s1649_s12   ;;  %s234_s16 = sadd.s32 1, %s1645_s11 }
   0x5   : > { %s231_s17 = ssub.s32 %s1649_s12, %s1746_s15  ;;  %p244_p0 = scmp.ne.s32.totalorder %s1645_s11, %s1641_s10 }
   0x6   : > { %p232_p1 = scmp.eq.s32.totalorder %s231_s17, 0  ;;  %p245_p2 = scmp.eq.s32.totalorder %s1742_s13, 1 }
   0x7   : > { %p250_p3 = scmp.ne.s32.totalorder %s1641_s10, %s1637_s30  ;;  %p251_p4 = scmp.eq.s32.totalorder %s1376_s14, 1 }
   0x8   : > { %s1757_s18 = scalar_select %p232_p1, %s1645_s11, %s234_s16  }
   0x9   : > { %p1759_p5 = por %p245_p2, %p244_p0  ;;  %p1763_p6 = por %p251_p4, %p250_p3 }
   0xa   : > { %p1379_p7 = scmp.ge.s32.totalorder %s1649_s12, 1  ;;  %p301_p8 = scmp.lt.s32.totalorder %s1649_s12, 3 }
   0xc   : > { %p302_p9 = pnand %p1379_p7, %p301_p8 }
   0xd   : > { %v359_v0 = vld [vmem:[%s1983_s1] sm:$0xff] (!%p302_p9)  ;;  %v360_v1 = vld [vmem:[%s1983_s1 + $0x8] sm:$0xff] (!%p302_p9)  ;;  %v361_v2 = vld [vmem:[%s1983_s1 + $0x10] sm:$0xff] (!%p302_p9)  ;;  %v1651_v3 = vmov (!%p302_p9), 0.0|0.0   ;;  %vm1652_vm0 = vmmov (!%p302_p9), 0   ;;  %v1653_v6 = vmov (!%p302_p9), 0.0  }
   0xe   : > { %305 = sbr.rel (%p302_p9) target bundleno = 2326 (0x916), region = 52  ;;  %1499 = vmatprep.subr.bf16.mxu0 (!%p302_p9), %v1651_v3  ;;  %v1500_v4 = vpack.c.bf16 (!%p302_p9), %v360_v1, %v359_v0  ;;  %v362_v5 = vld [vmem:[%s1983_s1 + $0x18] sm:$0xff] (!%p302_p9)  ;;  %1445 = vmatprep.mubr.msk.f32.mxu0 (!%p302_p9), %vm1652_vm0, %v1653_v6  ;;  %p344_p10 = scmp.lt.s32.totalorder (!%p302_p9), %s1742_s13, 1  ;;  %vm370_vm1 = vcmask (!%p302_p9), 261120   ;;  %v1384_v9 = vld [vmem:[%s1984_s2] ss:$0 sm:$0xff] (!%p302_p9) }
   0xf   : > { %1448 = vmatprep.subr.mxu1 (!%p302_p9), %v1653_v6  ;;  %1450 = vmatprep.mubr.msk.f32.mxu1 (!%p302_p9), %vm1652_vm0, %v1653_v6  ;;  %v1503_v7 = vpack.c.bf16 (!%p302_p9), %v362_v5, %v361_v2  ;;  %s1654_s24 = smov (!%p302_p9), 64   ;;  %s1655_s25 = smov (!%p302_p9), 96   ;;  %vm449_vm2 = vcmask (!%p302_p9), 64512   ;;  %v1659_v19 = vmov (!%p302_p9), 0   ;;  %v1142_v23 = vld [vmem:[%s1985_s3 + $0x8] sm:$0xff] (!%p302_p9)  ;;  %vm1137_vm5 = vcmask (!%p302_p9), 130048  }
  0x10   : > { %1501 = vmatpush3.bf16.msra.mxu0 (!%p302_p9), %v1500_v4  ;;  %s1656_s26 = smov (!%p302_p9), 88   ;;  %s1657_s27 = smov (!%p302_p9), 120   ;;  %vm1139_vm6 = vcmask (!%p302_p9), 195584  }
  0x11   : > { %1502 = vmatprep.subr.bf16.mxu0 (!%p302_p9), %v1651_v3  ;;  %s1658_s28 = smov (!%p302_p9), 80   ;;  %s1660_s23 = smov (!%p302_p9), 72  }
  0x12   : > { %s1664_s17 = smov (!%p302_p9), 48  }
  0x14   : > { %1504 = vmatpush3.bf16.msra.mxu0 (!%p302_p9), %v1503_v7 }
  0x15   : > { %s1789_s29 = scalar_select %p344_p10, %s1742_s13, 1  ;;  %1468 = vmatprep.subr.mxu0 %v1653_v6 }
  0x17   : > { %s1992_s14 = sshll.u32 %s1789_s29, 3  ;;  %s1382_s16 = sshll.u32 %s1789_s29, 1 }
  0x18   : > { %s347_s21 = scalar_lea.vmem %s1982_s0, %s1992_s14  ;;  %s351_s22 = scalar_lea.vmem %s1987_s5, %s1382_s16 }
  0x19   : > { %v1798_v8 = vld [vmem:[%s347_s21] sm:$0xff]  ;;  %s1663_s16 = smov 56   ;;  %s1665_s21 = smov 40  }
  0x1a   : > { %1446 = vmatmul.mubr.msk.f32.vlgmr.msra.gmra.mrb[0].mxu0 %vm370_vm1, %v1798_v8  ;;  %v444_v18 = vld [vmem:[%s351_s22] sm:$0x3]  ;;  %s1666_s22 = smov 8  }
  0x1b   : > { %1470 = vmatprep.mubr.msk.f32.mxu0 %vm1652_vm0, %v1653_v6  ;;  %vm445_vm3 = vnez %v444_v18 }
  0x1c   : > { %v525_v20 = vsel %vm445_vm3, 16843009, %v1659_v19 }
  0x1d   : > { %v526_v21 = vunpack.c.0.s8 %v525_v20 }
  0x1f   : > { %vm1828_vm4 = vcmp.ne.s32.totalorder %v526_v21, 0 }
  0xed   : > { %v440_v10 = vpop.f32.mrb[0].mxu0 }
  0xee   : > { %v1808_v11 = vadd.f32 %v1384_v9, %v440_v10  ;;  %v1447_v12 = vpop.f32.mrb[1].mxu0 }
  0xf0   : > { %541 = vrot.lane.b32.xlu1 %v1808_v11, %s1654_s24  ;;  %447 = vrot.lane.b32.xlu0 %v1808_v11, %s1655_s25  ;;  %s1661_s24 = smov 112   ;;  %s1662_s25 = smov 104  }
  0xf4   : > { %619 = vrot.lane.b32.xlu1 %v1808_v11, %s1656_s26  ;;  %s341_s26 = sand.u32 1, %s1641_s10  }
  0xf8   : > { %617 = vrot.lane.b32.xlu1 %v1808_v11, %s1657_s27  ;;  %s1380_s27 = sshll.u32 %s341_s26, 5 }
  0xfc   : > { %788 = vrot.lane.b32.xlu1 %v1808_v11, %s1658_s28  ;;  %s1850_s28 = scalar_lea.vmem [#allocation2], %s1380_s27 }
 0x162   : > { %v542_v13 = vpop.permute.xlu1 %541  ;;  %v448_v14 = vpop.permute.xlu0 %447 }
 0x163   : > { %1449 = vmatpush3.xpose.msk.msra.mxu1 %vm449_vm2, %v448_v14 }
 0x164   : > { %1453 = vmatprep.subr.mxu1 %v1653_v6 }
 0x166   : > { %v620_v15 = vpop.permute.xlu1 %619  ;;  %1451 = vmatmul.mubr.msk.f32.vlgmr.msra.gmra.mrb[0].mxu1 %vm449_vm2, %v1808_v11 }
 0x167   : > { %1454 = vmatpush3.msra.mxu1 %v542_v13  ;;  %1455 = vmatprep.mubr.msk.f32.mxu1 %vm1652_vm0, %v1653_v6 }
 0x168   : > { %1458 = vmatprep.subr.mxu1 %v1653_v6 }
 0x16a   : > { %v618_v16 = vpop.permute.xlu1 %617 }
 0x16e   : > { %v789_v17 = vpop.permute.xlu1 %788 }
 0x16f   : > { %1469 = vmatpush3.xpose.msk.msra.mxu0 %vm449_vm2, %v789_v17 }
 0x170   : > { %1478 = vmatprep.subr.mxu0 %v1653_v6 }
 0x239   : > { %v520_v22 = vpop.f32.mrb[0].mxu1 }
 0x23a   : > { %v524_v24 = vmul.f32 0.35355338, %v520_v22  ;;  %v1452_v25 = vpop.f32.mrb[1].mxu1  ;;  %v1141_v22 = vld [vmem:[%s1985_s3] sm:$0xff] }
 0x23b   : > { %v1143_v25 = vld [vmem:[%s1985_s3 + $0x10] sm:$0xff] }
 0x23c   : > { %v528_v26 = vsel %vm1828_vm4, -1e+09, %v524_v24  ;;  %v1506_v24 = vpack.c.bf16 %v1142_v23, %v1141_v22 }
 0x23d   : > { %v529_v27 = vsel %vm449_vm2, %v528_v26, -inf }
 0x23e   : > { %530 = vmax.xlane.f32.xlu0 %v529_v27 }
 0x254   : > { %957 = vrot.lane.b32.xlu0 %v1808_v11, %s1660_s23  ;;  %s1667_s23 = smov 16  }
 0x2cb   : > { %v531_v28 = vpop.xlane.xlu0 %530 }
 0x2cc   : > { %v532_v29 = vsub.f32 %v528_v26, %v531_v28 }
 0x2ce   : > { %v533_v30 = vmul.f32 1.442695, %v532_v29 }
 0x2cf   : > { %v958_v35 = vpop.permute.xlu0 %957 }
 0x2d0   : > { %1569 = vpow2.f32 %v533_v30 }
 0x2da   : > { %v1570_v31 = vpop.eup %1569 }
 0x2db   : > { %v535_v32 = vsel %vm449_vm2, %v1570_v31, 0.0 }
 0x2dc   : > { %536 = vadd.xlane.f32.xlu1 %v535_v32 }
 0x2ed   : > { %786 = vrot.lane.b32.xlu1 %v1808_v11, %s1661_s24  ;;  %s1668_s24 = smov 24  }
 0x2f1   : > { %955 = vrot.lane.b32.xlu1 %v1808_v11, %s1662_s25  ;;  %s1928_s25 = scalar_lea.sflag [#allocation3], %s341_s26 }
 0x369   : > { %v537_v33 = vpop.xlane.xlu1 %536 }
 0x36a   : > { %1571 = vrcp.f32 %v537_v33 }
 0x36d   : > { %v787_v34 = vpop.permute.xlu1 %786 }
 0x36e   : > { %1471 = vmatmul.mubr.msk.f32.vlgmr.msra.gmra.mrb[2].mxu0 %vm449_vm2, %v787_v34 }
 0x36f   : > { %1479 = vmatpush3.xpose.msk.msra.mxu0 %vm449_vm2, %v958_v35  ;;  %1480 = vmatprep.mubr.msk.f32.mxu0 %vm1652_vm0, %v1653_v6 }
 0x370   : > { %1505 = vmatprep.subr.bf16.mxu0 %v1651_v3 }
 0x371   : > { %v956_v36 = vpop.permute.xlu1 %955 }
 0x372   : > { %1481 = vmatmul.mubr.msk.f32.vlgmr.msra.gmra.mrb[4].mxu0 %vm449_vm2, %v956_v36 }
 0x373   : > { %1496 = vmatprep.mubr.msk.f32.mxu0 %vm1652_vm0, %v1653_v6  ;;  %1507 = vmatpush3.bf16.msra.mxu0 %v1506_v24 }
 0x374   : > { %v1572_v37 = vpop.eup %1571  ;;  %1508 = vmatprep.subr.bf16.mxu0 %v1651_v3 }
 0x375   : > { %v539_v38 = vmul.f32 %v1572_v37, %v1570_v31 }
 0x377   : > { %540 = vst.msk [vmem:[%s1850_s28] sm:$0xff] %vm449_vm2, %v539_v38  ;;  %1456 = vmatmul.mubr.msk.f32.vlgmr.msra.gmra.mrb[2].mxu1 %vm449_vm2, %v539_v38  ;;  %v1401_v38 = vld [vmem:[%s1986_s4] ss:$0 sm:$0xff] }
 0x378   : > { %1459 = vmatpush3.xpose.msk.msra.mxu1 %vm449_vm2, %v620_v15  ;;  %1460 = vmatprep.mubr.msk.f32.mxu1 %vm1652_vm0, %v1653_v6 }
 0x379   : > { %1463 = vmatprep.subr.mxu1 %v1653_v6 }
 0x37b   : > { %1461 = vmatmul.mubr.msk.f32.vlgmr.msra.gmra.mrb[4].mxu1 %vm449_vm2, %v618_v16 }
 0x37c   : > { %1465 = vmatprep.mubr.msk.f32.mxu1 %vm1652_vm0, %v1653_v6 }
 0x441   : > { %v860_v39 = vpop.f32.mrb[2].mxu0 }
 0x442   : > { %v864_v40 = vmul.f32 0.35355338, %v860_v39  ;;  %v1472_v41 = vpop.f32.mrb[3].mxu0 }
 0x444   : > { %v865_v42 = vsel %vm1828_vm4, -1e+09, %v864_v40 }
 0x445   : > { %v1029_v43 = vpop.f32.mrb[4].mxu0  ;;  %v866_v44 = vsel %vm449_vm2, %v865_v42, -inf }
 0x446   : > { %867 = vmax.xlane.f32.xlu0 %v866_v44  ;;  %v1482_v45 = vpop.f32.mrb[5].mxu0  ;;  %v1033_v49 = vmul.f32 0.35355338, %v1029_v43 }
 0x448   : > { %v1034_v54 = vsel %vm1828_vm4, -1e+09, %v1033_v49 }
 0x449   : > { %v1035_v55 = vsel %vm449_vm2, %v1034_v54, -inf }
 0x44a   : > { %v1865_v46 = vpop.f32.mrb[2].mxu1 }
 0x44b   : > { %v1457_v47 = vpop.f32.mrb[3].mxu1 }
 0x44e   : > { %v691_v48 = vpop.f32.mrb[4].mxu1 }
 0x44f   : > { %v695_v50 = vmul.f32 0.35355338, %v691_v48  ;;  %v1462_v51 = vpop.f32.mrb[5].mxu1 }
 0x451   : > { %v696_v52 = vsel %vm1828_vm4, -1e+09, %v695_v50 }
 0x452   : > { %v697_v53 = vsel %vm449_vm2, %v696_v52, -inf }
 0x453   : > { %698 = vmax.xlane.f32.xlu1 %v697_v53 }
 0x457   : > { %1036 = vmax.xlane.f32.xlu1 %v1035_v55 }
 0x4d3   : > { %v868_v56 = vpop.xlane.xlu0 %867 }
 0x4d4   : > { %v869_v57 = vsub.f32 %v865_v42, %v868_v56 }
 0x4d6   : > { %v870_v58 = vmul.f32 1.442695, %v869_v57 }
 0x4d8   : > { %1573 = vpow2.f32 %v870_v58 }
 0x4e0   : > { %v699_v59 = vpop.xlane.xlu1 %698 }
 0x4e1   : > { %v700_v4 = vsub.f32 %v696_v52, %v699_v59 }
 0x4e2   : > { %v1574_v60 = vpop.eup %1573 }
 0x4e3   : > { %v872_v61 = vsel %vm449_vm2, %v1574_v60, 0.0  ;;  %v701_v5 = vmul.f32 1.442695, %v700_v4 }
 0x4e4   : > { %873 = vadd.xlane.f32.xlu1 %v872_v61  ;;  %v1037_v62 = vpop.xlane.xlu1 %1036 }
 0x4e5   : > { %v1038_v63 = vsub.f32 %v1034_v54, %v1037_v62 }
 0x4e7   : > { %v1039_v0 = vmul.f32 1.442695, %v1038_v63 }
 0x4e9   : > { %1575 = vpow2.f32 %v1039_v0 }
 0x4ea   : > { %1577 = vpow2.f32 %v701_v5 }
 0x4f3   : > { %v1576_v1 = vpop.eup %1575 }
 0x4f4   : > { %v1041_v2 = vsel %vm449_vm2, %v1576_v1, 0.0  ;;  %v1578_v7 = vpop.eup %1577 }
 0x4f5   : > { %710 = vrot.lane.b32.xlu1 %v1808_v11, %s1663_s16  ;;  %1042 = vadd.xlane.f32.xlu0 %v1041_v2  ;;  %v703_v9 = vsel %vm449_vm2, %v1578_v7, 0.0  ;;  %s1410_s16 = sshll.u32 %s1742_s13, 9  ;;  %s1669_s13 = smov [#allocation2]  }
 0x50b   : > { %879 = vrot.lane.b32.xlu0 %v1808_v11, %s1664_s17  ;;  %s1278_s17 = sshll.u32 %s1850_s28, 4  ;;  %s1924_s17 = int_to_ptr.vmem [resolvable:$true] %s1278_s17 }
 0x50c   : > { %s1587_s27 = scalar_lea.vmem %s1924_s17, 512 }
 0x50d   : > { %p1588_p11 = scmp.ne.s32.totalorder %s1924_s17, %s1587_s27 }
 0x50f   : > { %p1589_p12 = pnand %p1588_p11, %p1759_p5 }
 0x511   : > { %p1590_p13 = pneg %p1589_p12 }
 0x519   : > { %704 = vadd.xlane.f32.xlu1 %v703_v9 }
 0x52a   : > { %1048 = vrot.lane.b32.xlu1 %v1808_v11, %s1665_s21 }
 0x571   : > { %v874_v10 = vpop.xlane.xlu1 %873 }
 0x572   : > { %1579 = vrcp.f32 %v874_v10 }
 0x575   : > { %v711_v12 = vpop.permute.xlu1 %710 }
 0x576   : > { %1464 = vmatpush3.msra.mxu1 %v711_v12 }
 0x577   : > { %1473 = vmatprep.subr.mxu1 %v1653_v6 }
 0x57c   : > { %v1580_v13 = vpop.eup %1579 }
 0x57d   : > { %v876_v14 = vmul.f32 %v1580_v13, %v1574_v60 }
 0x57f   : > { %1395 = vst.msk [vmem:[%s1850_s28 + $0x10] sm:$0xff] %vm449_vm2, %v876_v14 }
 0x582   : > { %v1043_v15 = vpop.xlane.xlu0 %1042 }
 0x583   : > { %1581 = vrcp.f32 %v1043_v15 }
 0x586   : > { %v880_v20 = vpop.permute.xlu0 %879 }
 0x58d   : > { %v1582_v16 = vpop.eup %1581 }
 0x58e   : > { %v1045_v17 = vmul.f32 %v1582_v16, %v1576_v1 }
 0x590   : > { %1399 = vst.msk [vmem:[%s1850_s28 + $0x18] sm:$0xff] %vm449_vm2, %v1045_v17 }
 0x5a6   : > { %v705_v18 = vpop.xlane.xlu1 %704 }
 0x5a7   : > { %1583 = vrcp.f32 %v705_v18 }
 0x5aa   : > { %v1049_v21 = vpop.permute.xlu1 %1048 }
 0x5b1   : > { %v1584_v11 = vpop.eup %1583 }
 0x5b2   : > { %v707_v19 = vmul.f32 %v1584_v11, %v1578_v7 }
 0x5b4   : > { %1391 = vst.msk [vmem:[%s1850_s28 + $0x8] sm:$0xff] %vm449_vm2, %v707_v19  ;;  %1466 = vmatmul.mubr.msk.f32.vlgmr.msra.gmra.mrb[6].mxu1 %vm449_vm2, %v707_v19  ;;  %s1591_s28 = sshll.u32 %s1669_s13, 4  ;;  %s1592_s28 = int_to_ptr.vmem [resolvable:$false] %s1591_s28 }
 0x5b5   : > { %1474 = vmatpush3.msra.mxu1 %v880_v20  ;;  %1475 = vmatprep.mubr.msk.f32.mxu1 %vm1652_vm0, %v1653_v6  ;;  %s1593_s14 = scalar_lea.vmem %s1592_s28, 1024  ;;  %p1594_p0 = scmp.lt.s32.totalorder %s1924_s17, %s1592_s28 }
 0x5b6   : > { %1483 = vmatprep.subr.mxu1 %v1653_v6  ;;  %p1595_p1 = scmp.lt.s32.totalorder %s1593_s14, %s1587_s27 }
 0x5b8   : > { %1476 = vmatmul.mubr.msk.f32.vlgmr.msra.gmra.mrb[8].mxu1 %vm449_vm2, %v876_v14  ;;  %p1596_p2 = por %p1595_p1, %p1594_p0 }
 0x5b9   : > { %1484 = vmatpush3.msra.mxu1 %v1049_v21  ;;  %1485 = vmatprep.mubr.msk.f32.mxu1 %vm1652_vm0, %v1653_v6  ;;  %v1144_v6 = vld [vmem:[%s1985_s3 + $0x18] sm:$0xff] }
 0x5ba   : > { %v1509_v26 = vpack.c.bf16 %v1144_v6, %v1143_v25  ;;  %p1597_p3 = pnand %p1596_p2, %p1590_p13 }
 0x5bc   : > { %1486 = vmatmul.mubr.msk.f32.vlgmr.msra.gmra.mrb[10].mxu1 %vm449_vm2, %v1045_v17  ;;  %1510 = vmatpush3.bf16.msra.mxu0 %v1509_v26 }
 0x687   : > { %v782_v27 = vpop.f32.mrb[6].mxu1 }
 0x688   : > { %1125 = vrot.lane.b32.xlu1 %v782_v27, %s1666_s22  ;;  %v1467_v28 = vpop.f32.mrb[7].mxu1 }
 0x68b   : > { %v951_v29 = vpop.f32.mrb[8].mxu1 }
 0x68c   : > { %1129 = vrot.lane.b32.xlu0 %v951_v29, %s1667_s23  ;;  %v1477_v30 = vpop.f32.mrb[9].mxu1 }
 0x68f   : > { %v1120_v3 = vpop.f32.mrb[10].mxu1 }
 0x690   : > { %1133 = vrot.lane.b32.xlu1 %v1120_v3, %s1668_s24  ;;  %v1487_v31 = vpop.f32.mrb[11].mxu1  ;;  %s1922_s24 = scalar_lea.hbm %s1991_s9, %s1410_s16 }
 0x6fa   : > { %v1126_v32 = vpop.permute.xlu1 %1125 }
 0x6fb   : > { %v1136_v34 = vsel %vm449_vm2, %v1865_v46, %v1126_v32 }
 0x6fe   : > { %v1130_v33 = vpop.permute.xlu0 %1129 }
 0x6ff   : > { %v1138_v35 = vsel %vm1137_vm5, %v1136_v34, %v1130_v33 }
 0x702   : > { %v1134_v36 = vpop.permute.xlu1 %1133 }
 0x703   : > { %v1140_v37 = vsel %vm1139_vm6, %v1138_v35, %v1134_v36 }
 0x704   : > { %1497 = vmatmul.mubr.msk.f32.vlgmr.msra.gmra.mrb[6].mxu0 %vm370_vm1, %v1140_v37 }
 0x7d7   : > { %v1221_v39 = vpop.f32.mrb[6].mxu0 }
 0x7d8   : > { %v1222_v40 = vadd.f32 %v1401_v38, %v1221_v39  ;;  %v1498_v41 = vpop.f32.mrb[7].mxu0 }
 0x7da   : > { %v1227_v42 = vadd.f32 %v1222_v40, %v1798_v8 }
 0x7dc   : > { %v1228_v43 = vsel %vm370_vm1, %v1227_v42, 0.0 }
 0x7dd   : > { %1229 = vadd.xlane.f32.xlu0 %v1228_v43 }
 0x86a   : > { %v1230_v44 = vpop.xlane.xlu0 %1229 }
 0x86b   : > { %v1232_v45 = vmul.f32 0.03125, %v1230_v44 }
 0x86d   : > { %v1233_v46 = vsub.f32 %v1227_v42, %v1232_v45 }
 0x86f   : > { %v1234_v47 = vmul.f32 %v1233_v46, %v1233_v46 }
 0x871   : > { %v1235_v48 = vsel %vm370_vm1, %v1234_v47, 0.0 }
 0x872   : > { %1236 = vadd.xlane.f32.xlu1 %v1235_v48 }
 0x873   : > { %1600 = shalt.err (!%p1597_p3)
}
 0x874   : > { %s1601_s26 = scalar_lea.hbm %s1922_s24, 512  ;;  %s1605_s23 = scalar_lea.hbm %s1991_s9, 1024 }
 0x875   : > { %p1602_p4 = scmp.ne.s32.totalorder %s1922_s24, %s1601_s26  ;;  %p1606_p9 = scmp.lt.u32.totalorder %s1922_s24, %s1991_s9 }
 0x876   : > { %p1607_p10 = scmp.lt.u32.totalorder %s1605_s23, %s1601_s26  ;;  %p1609_p12 = scmp.lt.u32.totalorder %s1601_s26, %s1922_s24 }
 0x877   : > { %p1603_p7 = pnand %p1602_p4, %p1759_p5 }
 0x878   : > { %p1608_p11 = por %p1607_p10, %p1606_p9 }
 0x879   : > { %p1604_p8 = pneg %p1603_p7 }
 0x87a   : > { %p1610_p13 = por %p1609_p12, %p1608_p11 }
 0x87c   : > { %p1611_p0 = pnand %p1610_p13, %p1604_p8 }
 0x87e   : > { %1614 = shalt.err (!%p1611_p0)
}
 0x87f   : > { %s1670_s14 = smov 128   ;;  %v1403_v52 = vld [vmem:[%s1988_s6] ss:$0 sm:$0xff]  ;;  %s1997_s19 = sshll.u32 %s1789_s29, 3 }
 0x880   : > { %1511 = dma.vmem_to_hbm [thread:$0]  (%p1759_p5), %s1924_s17, 512, %s1922_s24, %s1928_s25, %s1670_s14, %s1670_s14, %s1666_s22  }
 0x881   : > { %v1404_v54 = vld [vmem:[%s1989_s7] ss:$0 sm:$0xff]  ;;  %s355_s22 = scalar_lea.vmem %s1990_s8, %s1997_s19 }
 0x8ff   : > { %v1237_v8 = vpop.xlane.xlu1 %1236 }
 0x900   : > { %v1238_v49 = vmul.f32 0.03125, %v1237_v8 }
 0x902   : > { %v1239_v50 = vadd.f32 1e-12, %v1238_v49 }
 0x904   : > { %1585 = vrsqrt.f32 %v1239_v50 }
 0x90e   : > { %v1586_v51 = vpop.eup %1585 }
 0x90f   : > { %v1241_v53 = vmul.f32 %v1586_v51, %v1233_v46 }
 0x911   : > { %v1248_v55 = vmul.f32 %v1403_v52, %v1241_v53 }
 0x913   : > { %v1255_v56 = vadd.f32 %v1404_v54, %v1248_v55 }
 0x915   : > { %1256 = vst.msk [vmem:[%s355_s22] sm:$0xff] %vm370_vm1, %v1255_v56 }
 0x916 PF: > { %p1517_p5 = scmp.ge.s32.totalorder %s1649_s12, 2  ;;  %s1300_s17 = sand.u32 1, %s1637_s30  }
 0x917   : > { %s1301_s24 = scalar_lea.sflag [#allocation3], %s1300_s17 }
 0x918   : > { %p1514_p1 = pnand %p1517_p5, %p1763_p6 }
 0x91a   : > { %1632 = dma.done.wait (!%p1514_p1), %s1301_s24, 512  }
 0x91b   : > { %1634 = vsyncadd (!%p1514_p1), %s1301_s24, 4294966784  ;;  %p20_p2 = scmp.ge.s32.totalorder %s1746_s15, 4   ;;  %s1998_s30 = smov %s1641_s10 }
 0x91c   : > { %s1999_s10 = smov %s1645_s11  ;;  %s2000_s11 = smov %s1757_s18 }
 0x91d   : > { %s2001_s12 = smov %s1746_s15  ;;  %22 = sbr.rel (!%p20_p2) target bundleno = 3 (0x3), region = 105 }
 0x924   :  { %1306 = vsyncpa [#allocation3], 1 }
 0x925   :  { %1308 = vsyncpa [#allocation3 + $0x1], 1 }

// kernel: _lambda_.15
= control target key start
LH: loop header
LB: loop body
LE: loop exit
PB: predicated region body
PF: predicated region fallthrough
CT: control target
= control target key end

     0   :  { %16 = vsyncpa [#allocation3], 0  ;;  %s2167_s0 = inlined_call_operand.vmem [shape: f32[2,8,32], index: 0, kind: input, shape index: {}]   ;;  %s2168_s1 = inlined_call_operand.vmem [shape: f32[2,8,32], index: 1, kind: input, shape index: {}]   ;;  %s2169_s2 = inlined_call_operand.vmem [shape: f32[32,96], index: 2, kind: input, shape index: {}]   ;;  %s2170_s3 = inlined_call_operand.vmem [shape: f32[1,96], index: 3, kind: input, shape index: {}]   ;;  %s2171_s4 = inlined_call_operand.vmem [shape: f32[32,32], index: 4, kind: input, shape index: {}]   ;;  %s2172_s5 = inlined_call_operand.vmem [shape: f32[1,32], index: 5, kind: input, shape index: {}, may-alias: {5,8}]   ;;  %s2173_s6 = inlined_call_operand.vmem [shape: s8[2,8,8], index: 6, kind: input, shape index: {}]   ;;  %s2174_s7 = inlined_call_operand.vmem [shape: f32[1,32], index: 7, kind: input, shape index: {}]   ;;  %s2175_s8 = inlined_call_operand.vmem [shape: f32[1,32], index: 8, kind: input, shape index: {}, may-alias: {5,8}]   ;;  %s2176_s9 = inlined_call_operand.vmem [shape: f32[2,8,32], index: 9, kind: output, shape index: {0}]   ;;  %s2177_s10 = inlined_call_operand.hbm [shape: f32[2,4,8,8], index: 10, kind: output, shape index: {1}]  }
   0x1   :  { %18 = vsyncpa [#allocation3 + $0x1], 0  ;;  %s1900_s13 = smov 0   ;;  %s1902_s14 = smov 0  }
   0x2   :  { %s1904_s15 = smov 0   ;;  %s1906_s16 = smov 0  }
   0x3 LB: > { %s1921_s17 = sadd.s32 4294967295, %s1827_s16   ;;  %s1524_s18 = sadd.s32 4294967294, %s1827_s16   ;;  %s1827_s16 = sphi %s1906_s16, %s2187_s16   ;;  %s1823_s15 = sphi %s1904_s15, %s2186_s15   ;;  %s1819_s14 = sphi %s1902_s14, %s2185_s14   ;;  %s1815_s13 = sphi %s1900_s13, %s2184_s13  }
   0x4   : > { %s1925_s19 = sadd.s32 1, %s1827_s16   ;;  %s261_s20 = sadd.s32 1, %s1823_s15 }
   0x5   : > { %s258_s21 = ssub.s32 %s1827_s16, %s1925_s19  ;;  %p271_p0 = scmp.ne.s32.totalorder %s1823_s15, %s1819_s14 }
   0x6   : > { %p259_p1 = scmp.eq.s32.totalorder %s258_s21, 0  ;;  %p272_p2 = scmp.eq.s32.totalorder %s1921_s17, 1 }
   0x7   : > { %p277_p3 = scmp.ne.s32.totalorder %s1819_s14, %s1815_s13  ;;  %p278_p4 = scmp.eq.s32.totalorder %s1524_s18, 1 }
   0x8   : > { %s1936_s22 = scalar_select %p259_p1, %s1823_s15, %s261_s20  }
   0x9   : > { %p1938_p5 = por %p272_p2, %p271_p0  ;;  %p1942_p6 = por %p278_p4, %p277_p3 }
   0xa   : > { %p1527_p7 = scmp.ge.s32.totalorder %s1827_s16, 1  ;;  %p335_p8 = scmp.lt.s32.totalorder %s1827_s16, 3 }
   0xc   : > { %p336_p9 = pnand %p1527_p7, %p335_p8 }
   0xd   : > { %v404_v0 = vld [vmem:[%s2169_s2] sm:$0xff] (!%p336_p9)  ;;  %v405_v1 = vld [vmem:[%s2169_s2 + $0x8] sm:$0xff] (!%p336_p9)  ;;  %v406_v2 = vld [vmem:[%s2169_s2 + $0x10] sm:$0xff] (!%p336_p9)  ;;  %v1829_v5 = vmov (!%p336_p9), 0.0|0.0   ;;  %p384_p10 = scmp.lt.s32.totalorder (!%p336_p9), %s1921_s17, 1  ;;  %vm1830_vm0 = vmmov (!%p336_p9), 0  }
   0xe   : > { %339 = sbr.rel (%p336_p9) target bundleno = 1869 (0x74d), region = 56  ;;  %v1737_v3 = vpack.i.bf16 (!%p336_p9), %v405_v1, %v404_v0  ;;  %v407_v4 = vld [vmem:[%s2169_s2 + $0x18] sm:$0xff] (!%p336_p9)  ;;  %1665 = vmatprep.subr.bf16.mxu0 (!%p336_p9), %v1829_v5  ;;  %v1666_v6 = vpack.c.bf16 (!%p336_p9), %v405_v1, %v404_v0  ;;  %1671 = vmatprep.subr.bf16.mxu1 (!%p336_p9), %v1829_v5  ;;  %v1533_v7 = vld [vmem:[%s2170_s3] ss:$0 sm:$0xff] (!%p336_p9)  ;;  %v1831_v8 = vmov (!%p336_p9), 0.0   ;;  %s1832_s21 = smov (!%p336_p9), 96  }
   0xf   : > { %1600 = vmatprep.mubr.msk.f32.mxu0 (!%p336_p9), %vm1830_vm0, %v1831_v8  ;;  %1611 = vmatprep.mubr.msk.f32.mxu1 (!%p336_p9), %vm1830_vm0, %v1831_v8  ;;  %v1742_v9 = vpack.i.bf16 (!%p336_p9), %v407_v4, %v406_v2  ;;  %v1669_v10 = vpack.c.bf16 (!%p336_p9), %v407_v4, %v406_v2  ;;  %vm415_vm1 = vcmask (!%p336_p9), 261120   ;;  %s1833_s18 = smov (!%p336_p9), 120   ;;  %s1834_s20 = smov (!%p336_p9), 112   ;;  %vm583_vm2 = vcmask (!%p336_p9), 64512   ;;  %v1280_v39 = vld [vmem:[%s2171_s4 + $0x18] sm:$0xff] (!%p336_p9) }
  0x10   : > { %1738 = vrot.lane.b32.xlu0 (!%p336_p9), %v1737_v3, %s1832_s21  ;;  %1667 = vmatpush3.bf16.msra.mxu0 (!%p336_p9), %v1666_v6  ;;  %s1835_s27 = smov (!%p336_p9), 104   ;;  %v1836_v35 = vmov (!%p336_p9), 0   ;;  %s1842_s30 = smov (!%p336_p9), 24   ;;  %vm1273_vm5 = vcmask (!%p336_p9), 130048   ;;  %vm1275_vm6 = vcmask (!%p336_p9), 195584  }
  0x11   : > { %1668 = vmatprep.subr.bf16.mxu0 (!%p336_p9), %v1829_v5  ;;  %505 = vrot.lane.b32.xlu1 (!%p336_p9), %v1533_v7, %s1832_s21 }
  0x14   : > { %1743 = vrot.lane.b32.xlu0 (!%p336_p9), %v1742_v9, %s1832_s21  ;;  %1670 = vmatpush3.bf16.msra.mxu0 (!%p336_p9), %v1669_v10 }
  0x15   : > { %s1972_s25 = scalar_select %p384_p10, %s1921_s17, 1  ;;  %1624 = vmatprep.subr.mxu0 %v1831_v8 }
  0x17   : > { %s1977_s26 = sshll.u32 %s1972_s25, 3  ;;  %s1531_s28 = sshll.u32 %s1972_s25, 1 }
  0x18   : > { %s387_s29 = scalar_lea.vmem %s2167_s0, %s1977_s26  ;;  %s391_s12 = scalar_lea.vmem %s2168_s1, %s1977_s26 }
  0x19   : > { %v1984_v11 = vld [vmem:[%s387_s29] sm:$0xff]  ;;  %s395_s11 = scalar_lea.vmem %s2173_s6, %s1531_s28  ;;  %s1837_s25 = smov 88  }
  0x1a   : > { %1601 = vmatmul.mubr.msk.f32.vlgmr.msra.gmra.mrb[0].mxu0 %vm415_vm1, %v1984_v11  ;;  %v403_v20 = vld [vmem:[%s391_s12] sm:$0xff]  ;;  %s1839_s12 = smov 72   ;;  %s2178_s28 = smov 8  }
  0x1b   : > { %1626 = vmatprep.mubr.msk.f32.mxu0 %vm1830_vm0, %v1831_v8  ;;  %v581_v34 = vld [vmem:[%s395_s11] sm:$0x3]  ;;  %s1841_s29 = smov 16  }
  0x1c   : > { %vm582_vm3 = vnez %v581_v34 }
  0x1d   : > { %v661_v36 = vsel %vm582_vm3, 16843009, %v1836_v35 }
  0x1e   : > { %v662_v37 = vunpack.c.0.s8 %v661_v36  ;;  %v1277_v36 = vld [vmem:[%s2171_s4] sm:$0xff] }
  0x20   : > { %vm2030_vm4 = vcmp.ne.s32.totalorder %v662_v37, 0  ;;  %v1278_v37 = vld [vmem:[%s2171_s4 + $0x8] sm:$0xff] }
  0x82   : > { %v1739_v12 = vpop.permute.xlu0 %1738 }
  0x83   : > { %v1741_v13 = vunpack.i.h.bf16 %v1739_v12  ;;  %v1740_v14 = vunpack.i.l.bf16 %v1739_v12  ;;  %v506_v24 = vpop.permute.xlu1 %505 }
  0x85   : > { %v1672_v15 = vpack.c.bf16 %v1741_v13, %v1740_v14 }
  0x86   : > { %v1744_v16 = vpop.permute.xlu0 %1743 }
  0x87   : > { %v1746_v17 = vunpack.i.h.bf16 %v1744_v16  ;;  %v1745_v18 = vunpack.i.l.bf16 %v1744_v16  ;;  %1673 = vmatpush3.bf16.msra.mxu1 %v1672_v15 }
  0x88   : > { %1674 = vmatprep.subr.bf16.mxu1 %v1829_v5 }
  0x89   : > { %v1675_v19 = vpack.c.bf16 %v1746_v17, %v1745_v18 }
  0x8b   : > { %1676 = vmatpush3.bf16.msra.mxu1 %v1675_v19 }
  0x8c   : > { %1614 = vmatprep.subr.mxu1 %v1831_v8 }
  0x8e   : > { %1612 = vmatmul.mubr.msk.f32.vlgmr.msra.gmra.mrb[0].mxu1 %vm415_vm1, %v403_v20 }
  0x8f   : > { %1616 = vmatprep.mubr.msk.f32.mxu1 %vm1830_vm0, %v1831_v8 }
  0xed   : > { %v485_v21 = vpop.f32.mrb[0].mxu0 }
  0xee   : > { %v486_v22 = vadd.f32 %v1533_v7, %v485_v21  ;;  %v1602_v23 = vpop.f32.mrb[1].mxu0 }
  0xf0   : > { %753 = vrot.lane.b32.xlu0 %v486_v22, %s1833_s18 }
  0xf4   : > { %922 = vrot.lane.b32.xlu0 %v486_v22, %s1834_s20 }
  0xf8   : > { %1091 = vrot.lane.b32.xlu0 %v486_v22, %s1835_s27 }
 0x161   : > { %v577_v25 = vpop.f32.mrb[0].mxu1 }
 0x162   : > { %v2000_v26 = vadd.f32 %v577_v25, %v506_v24  ;;  %v1613_v27 = vpop.f32.mrb[1].mxu1  ;;  %v754_v28 = vpop.permute.xlu0 %753 }
 0x164   : > { %755 = vrot.lane.b32.xlu1 %v2000_v26, %s1833_s18  ;;  %1615 = vmatpush3.xpose.msk.msra.mxu1 %vm583_vm2, %v2000_v26  ;;  %s381_s18 = sand.u32 1, %s1819_s14  }
 0x165   : > { %1619 = vmatprep.subr.mxu1 %v1831_v8  ;;  %s2114_s11 = scalar_lea.sflag [#allocation3], %s381_s18 }
 0x166   : > { %v923_v31 = vpop.permute.xlu0 %922 }
 0x167   : > { %1617 = vmatmul.mubr.msk.f32.vlgmr.msra.gmra.mrb[2].mxu1 %vm583_vm2, %v486_v22 }
 0x168   : > { %924 = vrot.lane.b32.xlu1 %v2000_v26, %s1834_s20  ;;  %1621 = vmatprep.mubr.msk.f32.mxu1 %vm1830_vm0, %v1831_v8  ;;  %s1528_s20 = sshll.u32 %s381_s18, 5 }
 0x16a   : > { %v1092_v33 = vpop.permute.xlu0 %1091 }
 0x16c   : > { %1093 = vrot.lane.b32.xlu1 %v2000_v26, %s1835_s27  ;;  %s2059_s27 = scalar_lea.vmem [#allocation2], %s1528_s20 }
 0x1d6   : > { %v756_v29 = vpop.permute.xlu1 %755 }
 0x1d7   : > { %1625 = vmatpush3.xpose.msk.msra.mxu0 %vm583_vm2, %v756_v29 }
 0x1d8   : > { %1634 = vmatprep.subr.mxu0 %v1831_v8 }
 0x1da   : > { %v925_v30 = vpop.permute.xlu1 %924  ;;  %1627 = vmatmul.mubr.msk.f32.vlgmr.msra.gmra.mrb[2].mxu0 %vm583_vm2, %v754_v28 }
 0x1db   : > { %1635 = vmatpush3.xpose.msk.msra.mxu0 %vm583_vm2, %v925_v30  ;;  %1636 = vmatprep.mubr.msk.f32.mxu0 %vm1830_vm0, %v1831_v8 }
 0x1dc   : > { %1644 = vmatprep.subr.mxu0 %v1831_v8 }
 0x1de   : > { %v1094_v32 = vpop.permute.xlu1 %1093  ;;  %1637 = vmatmul.mubr.msk.f32.vlgmr.msra.gmra.mrb[4].mxu0 %vm583_vm2, %v923_v31 }
 0x1df   : > { %1645 = vmatpush3.xpose.msk.msra.mxu0 %vm583_vm2, %v1094_v32  ;;  %1646 = vmatprep.mubr.msk.f32.mxu0 %vm1830_vm0, %v1831_v8 }
 0x1e0   : > { %1677 = vmatprep.subr.bf16.mxu0 %v1829_v5 }
 0x1e2   : > { %1647 = vmatmul.mubr.msk.f32.vlgmr.msra.gmra.mrb[6].mxu0 %vm583_vm2, %v1092_v33 }
 0x1e3   : > { %1662 = vmatprep.mubr.msk.f32.mxu0 %vm1830_vm0, %v1831_v8 }
 0x23a   : > { %v656_v38 = vpop.f32.mrb[2].mxu1 }
 0x23b   : > { %v660_v40 = vmul.f32 0.35355338, %v656_v38  ;;  %v1618_v41 = vpop.f32.mrb[3].mxu1  ;;  %v1678_v38 = vpack.c.bf16 %v1278_v37, %v1277_v36 }
 0x23d   : > { %v664_v42 = vsel %vm2030_vm4, -1e+09, %v660_v40  ;;  %1679 = vmatpush3.bf16.msra.mxu0 %v1678_v38 }
 0x23e   : > { %v665_v43 = vsel %vm583_vm2, %v664_v42, -inf  ;;  %1680 = vmatprep.subr.bf16.mxu0 %v1829_v5 }
 0x23f   : > { %666 = vmax.xlane.f32.xlu1 %v665_v43 }
 0x2ad   : > { %v827_v44 = vpop.f32.mrb[2].mxu0 }
 0x2ae   : > { %v831_v45 = vmul.f32 0.35355338, %v827_v44  ;;  %v1628_v46 = vpop.f32.mrb[3].mxu0 }
 0x2b0   : > { %v832_v47 = vsel %vm2030_vm4, -1e+09, %v831_v45 }
 0x2b1   : > { %v996_v48 = vpop.f32.mrb[4].mxu0  ;;  %v833_v49 = vsel %vm583_vm2, %v832_v47, -inf }
 0x2b2   : > { %v1000_v50 = vmul.f32 0.35355338, %v996_v48  ;;  %834 = vmax.xlane.f32.xlu0 %v833_v49  ;;  %v1638_v51 = vpop.f32.mrb[5].mxu0 }
 0x2b4   : > { %v1001_v52 = vsel %vm2030_vm4, -1e+09, %v1000_v50 }
 0x2b5   : > { %v1165_v53 = vpop.f32.mrb[6].mxu0  ;;  %v1002_v54 = vsel %vm583_vm2, %v1001_v52, -inf }
 0x2b6   : > { %v1169_v55 = vmul.f32 0.35355338, %v1165_v53  ;;  %1003 = vmax.xlane.f32.xlu0 %v1002_v54  ;;  %v1648_v56 = vpop.f32.mrb[7].mxu0 }
 0x2b8   : > { %v1170_v57 = vsel %vm2030_vm4, -1e+09, %v1169_v55 }
 0x2b9   : > { %v1171_v58 = vsel %vm583_vm2, %v1170_v57, -inf }
 0x2ba   : > { %1172 = vmax.xlane.f32.xlu1 %v1171_v58 }
 0x2cb   : > { %846 = vrot.lane.b32.xlu1 %v2000_v26, %s1837_s25 }
 0x2cc   : > { %v667_v59 = vpop.xlane.xlu1 %666 }
 0x2cd   : > { %v668_v60 = vsub.f32 %v664_v42, %v667_v59 }
 0x2cf   : > { %v669_v61 = vmul.f32 1.442695, %v668_v60 }
 0x2d1   : > { %1747 = vpow2.f32 %v669_v61 }
 0x2db   : > { %v1748_v62 = vpop.eup %1747 }
 0x2dc   : > { %v671_v63 = vsel %vm583_vm2, %v1748_v62, 0.0 }
 0x2dd   : > { %672 = vadd.xlane.f32.xlu0 %v671_v63 }
 0x2f3   : > { %677 = vrot.lane.b32.xlu0 %v2000_v26, %s1832_s21  ;;  %s1838_s21 = smov 80  }
 0x33f   : > { %v835_v0 = vpop.xlane.xlu0 %834 }
 0x340   : > { %v836_v1 = vsub.f32 %v832_v47, %v835_v0 }
 0x342   : > { %v837_v2 = vmul.f32 1.442695, %v836_v1 }
 0x343   : > { %v1004_v3 = vpop.xlane.xlu0 %1003 }
 0x344   : > { %1749 = vpow2.f32 %v837_v2  ;;  %v1005_v4 = vsub.f32 %v1001_v52, %v1004_v3  ;;  %v1551_v52 = vld [vmem:[%s2172_s5] ss:$0 sm:$0xff] }
 0x346   : > { %v1006_v6 = vmul.f32 1.442695, %v1005_v4 }
 0x347   : > { %v1173_v7 = vpop.xlane.xlu1 %1172 }
 0x348   : > { %1751 = vpow2.f32 %v1006_v6  ;;  %v1174_v9 = vsub.f32 %v1170_v57, %v1173_v7 }
 0x34a   : > { %v1175_v10 = vmul.f32 1.442695, %v1174_v9 }
 0x34b   : > { %v847_v22 = vpop.permute.xlu1 %846 }
 0x34c   : > { %1753 = vpow2.f32 %v1175_v10 }
 0x34e   : > { %v1750_v12 = vpop.eup %1749 }
 0x34f   : > { %v839_v13 = vsel %vm583_vm2, %v1750_v12, 0.0 }
 0x350   : > { %840 = vadd.xlane.f32.xlu1 %v839_v13 }
 0x352   : > { %v1752_v14 = vpop.eup %1751 }
 0x353   : > { %v1008_v15 = vsel %vm583_vm2, %v1752_v14, 0.0 }
 0x354   : > { %1009 = vadd.xlane.f32.xlu0 %v1008_v15 }
 0x356   : > { %v1754_v16 = vpop.eup %1753 }
 0x357   : > { %v1177_v17 = vsel %vm583_vm2, %v1754_v16, 0.0 }
 0x358   : > { %1178 = vadd.xlane.f32.xlu1 %v1177_v17 }
 0x369   : > { %1015 = vrot.lane.b32.xlu1 %v2000_v26, %s1838_s21  ;;  %s1560_s21 = sshll.u32 %s1921_s17, 9  ;;  %s1843_s17 = smov [#allocation2]  }
 0x36a   : > { %1184 = vrot.lane.b32.xlu0 %v2000_v26, %s1839_s12  ;;  %v673_v18 = vpop.xlane.xlu0 %672  ;;  %s1414_s12 = sshll.u32 %s2059_s27, 4  ;;  %s2110_s12 = int_to_ptr.vmem [resolvable:$true] %s1414_s12 }
 0x36b   : > { %1755 = vrcp.f32 %v673_v18  ;;  %s1765_s25 = scalar_lea.vmem %s2110_s12, 512 }
 0x36c   : > { %p1766_p11 = scmp.ne.s32.totalorder %s2110_s12, %s1765_s25 }
 0x36e   : > { %v678_v19 = vpop.permute.xlu0 %677  ;;  %p1767_p12 = pnand %p1766_p11, %p1938_p5 }
 0x36f   : > { %1620 = vmatpush3.msra.mxu1 %v678_v19 }
 0x370   : > { %1629 = vmatprep.subr.mxu1 %v1831_v8  ;;  %p1768_p13 = pneg %p1767_p12 }
 0x375   : > { %v1756_v20 = vpop.eup %1755 }
 0x376   : > { %v675_v21 = vmul.f32 %v1756_v20, %v1748_v62 }
 0x378   : > { %676 = vst.msk [vmem:[%s2059_s27] sm:$0xff] %vm583_vm2, %v675_v21  ;;  %1622 = vmatmul.mubr.msk.f32.vlgmr.msra.gmra.mrb[4].mxu1 %vm583_vm2, %v675_v21 }
 0x379   : > { %1630 = vmatpush3.msra.mxu1 %v847_v22  ;;  %1631 = vmatprep.mubr.msk.f32.mxu1 %vm1830_vm0, %v1831_v8 }
 0x37a   : > { %1639 = vmatprep.subr.mxu1 %v1831_v8 }
 0x3dd   : > { %v841_v23 = vpop.xlane.xlu1 %840 }
 0x3de   : > { %1757 = vrcp.f32 %v841_v23 }
 0x3e1   : > { %v1010_v24 = vpop.xlane.xlu0 %1009 }
 0x3e2   : > { %1759 = vrcp.f32 %v1010_v24 }
 0x3e5   : > { %v1179_v25 = vpop.xlane.xlu1 %1178  ;;  %v1185_v31 = vpop.permute.xlu0 %1184 }
 0x3e6   : > { %1761 = vrcp.f32 %v1179_v25 }
 0x3e8   : > { %v1758_v26 = vpop.eup %1757 }
 0x3e9   : > { %v843_v27 = vmul.f32 %v1758_v26, %v1750_v12  ;;  %v1016_v28 = vpop.permute.xlu1 %1015 }
 0x3eb   : > { %1541 = vst.msk [vmem:[%s2059_s27 + $0x8] sm:$0xff] %vm583_vm2, %v843_v27  ;;  %1632 = vmatmul.mubr.msk.f32.vlgmr.msra.gmra.mrb[6].mxu1 %vm583_vm2, %v843_v27 }
 0x3ec   : > { %v1760_v29 = vpop.eup %1759  ;;  %1640 = vmatpush3.msra.mxu1 %v1016_v28  ;;  %1641 = vmatprep.mubr.msk.f32.mxu1 %vm1830_vm0, %v1831_v8 }
 0x3ed   : > { %v1012_v30 = vmul.f32 %v1760_v29, %v1752_v14  ;;  %1649 = vmatprep.subr.mxu1 %v1831_v8 }
 0x3ef   : > { %1545 = vst.msk [vmem:[%s2059_s27 + $0x10] sm:$0xff] %vm583_vm2, %v1012_v30  ;;  %1642 = vmatmul.mubr.msk.f32.vlgmr.msra.gmra.mrb[8].mxu1 %vm583_vm2, %v1012_v30 }
 0x3f0   : > { %v1762_v32 = vpop.eup %1761  ;;  %1650 = vmatpush3.msra.mxu1 %v1185_v31  ;;  %1651 = vmatprep.mubr.msk.f32.mxu1 %vm1830_vm0, %v1831_v8  ;;  %v1279_v8 = vld [vmem:[%s2171_s4 + $0x10] sm:$0xff] }
 0x3f1   : > { %v1181_v33 = vmul.f32 %v1762_v32, %v1754_v16  ;;  %v1681_v40 = vpack.c.bf16 %v1280_v39, %v1279_v8 }
 0x3f3   : > { %1549 = vst.msk [vmem:[%s2059_s27 + $0x18] sm:$0xff] %vm583_vm2, %v1181_v33  ;;  %1652 = vmatmul.mubr.msk.f32.vlgmr.msra.gmra.mrb[10].mxu1 %vm583_vm2, %v1181_v33  ;;  %1682 = vmatpush3.bf16.msra.mxu0 %v1681_v40  ;;  %s1769_s27 = sshll.u32 %s1843_s17, 4  ;;  %s1770_s27 = int_to_ptr.vmem [resolvable:$false] %s1769_s27 }
 0x3f4   : > { %p1772_p0 = scmp.lt.s32.totalorder %s2110_s12, %s1770_s27 }
 0x44b   : > { %v749_v34 = vpop.f32.mrb[4].mxu1 }
 0x44c   : > { %v1623_v35 = vpop.f32.mrb[5].mxu1 }
 0x4be   : > { %v918_v41 = vpop.f32.mrb[6].mxu1 }
 0x4bf   : > { %1261 = vrot.lane.b32.xlu1 %v918_v41, %s2178_s28  ;;  %v1633_v42 = vpop.f32.mrb[7].mxu1  ;;  %s1771_s28 = scalar_lea.vmem %s1770_s27, 1024 }
 0x4c0   : > { %p1773_p1 = scmp.lt.s32.totalorder %s1771_s28, %s1765_s25 }
 0x4c2   : > { %v1087_v43 = vpop.f32.mrb[8].mxu1  ;;  %p1774_p2 = por %p1773_p1, %p1772_p0 }
 0x4c3   : > { %1265 = vrot.lane.b32.xlu0 %v1087_v43, %s1841_s29  ;;  %v1643_v44 = vpop.f32.mrb[9].mxu1 }
 0x4c4   : > { %p1775_p3 = pnand %p1774_p2, %p1768_p13 }
 0x4c6   : > { %v1256_v5 = vpop.f32.mrb[10].mxu1 }
 0x4c7   : > { %1269 = vrot.lane.b32.xlu1 %v1256_v5, %s1842_s30  ;;  %v1653_v45 = vpop.f32.mrb[11].mxu1  ;;  %s2108_s30 = scalar_lea.hbm %s2177_s10, %s1560_s21 }
 0x531   : > { %v1262_v46 = vpop.permute.xlu1 %1261 }
 0x532   : > { %v1272_v48 = vsel %vm583_vm2, %v749_v34, %v1262_v46 }
 0x535   : > { %v1266_v47 = vpop.permute.xlu0 %1265 }
 0x536   : > { %v1274_v49 = vsel %vm1273_vm5, %v1272_v48, %v1266_v47 }
 0x539   : > { %v1270_v50 = vpop.permute.xlu1 %1269 }
 0x53a   : > { %v1276_v51 = vsel %vm1275_vm6, %v1274_v49, %v1270_v50 }
 0x53b   : > { %1663 = vmatmul.mubr.msk.f32.vlgmr.msra.gmra.mrb[8].mxu0 %vm415_vm1, %v1276_v51 }
 0x60e   : > { %v1357_v53 = vpop.f32.mrb[8].mxu0 }
 0x60f   : > { %v1358_v54 = vadd.f32 %v1551_v52, %v1357_v53  ;;  %v1664_v55 = vpop.f32.mrb[9].mxu0 }
 0x611   : > { %v1363_v56 = vadd.f32 %v1358_v54, %v1984_v11 }
 0x613   : > { %v1364_v57 = vsel %vm415_vm1, %v1363_v56, 0.0 }
 0x614   : > { %1365 = vadd.xlane.f32.xlu0 %v1364_v57 }
 0x6a1   : > { %v1366_v58 = vpop.xlane.xlu0 %1365 }
 0x6a2   : > { %v1368_v59 = vmul.f32 0.03125, %v1366_v58 }
 0x6a4   : > { %v1369_v60 = vsub.f32 %v1363_v56, %v1368_v59 }
 0x6a6   : > { %v1370_v61 = vmul.f32 %v1369_v60, %v1369_v60 }
 0x6a8   : > { %v1371_v62 = vsel %vm415_vm1, %v1370_v61, 0.0 }
 0x6a9   : > { %1372 = vadd.xlane.f32.xlu1 %v1371_v62 }
 0x6aa   : > { %1778 = shalt.err (!%p1775_p3)
}
 0x6ab   : > { %s1779_s18 = scalar_lea.hbm %s2108_s30, 512  ;;  %s1783_s29 = scalar_lea.hbm %s2177_s10, 1024 }
 0x6ac   : > { %p1780_p4 = scmp.ne.s32.totalorder %s2108_s30, %s1779_s18  ;;  %p1784_p9 = scmp.lt.u32.totalorder %s2108_s30, %s2177_s10 }
 0x6ad   : > { %p1785_p10 = scmp.lt.u32.totalorder %s1783_s29, %s1779_s18  ;;  %p1787_p12 = scmp.lt.u32.totalorder %s1779_s18, %s2108_s30 }
 0x6ae   : > { %p1781_p7 = pnand %p1780_p4, %p1938_p5 }
 0x6af   : > { %p1786_p11 = por %p1785_p10, %p1784_p9 }
 0x6b0   : > { %p1782_p8 = pneg %p1781_p7 }
 0x6b1   : > { %p1788_p13 = por %p1787_p12, %p1786_p11 }
 0x6b3   : > { %p1789_p0 = pnand %p1788_p13, %p1782_p8 }
 0x6b5   : > { %1792 = shalt.err (!%p1789_p0)
}
 0x6b6   : > { %s1844_s28 = smov 128   ;;  %s2183_s25 = smov 8   ;;  %v1553_v2 = vld [vmem:[%s2174_s7] ss:$0 sm:$0xff] }
 0x6b7   : > { %1683 = dma.vmem_to_hbm [thread:$0]  (%p1938_p5), %s2110_s12, 512, %s2108_s30, %s2114_s11, %s1844_s28, %s1844_s28, %s2183_s25  }
 0x6b8   : > { %v1554_v4 = vld [vmem:[%s2175_s8] ss:$0 sm:$0xff]  ;;  %s399_s27 = scalar_lea.vmem %s2176_s9, %s1977_s26 }
 0x736   : > { %v1373_v11 = vpop.xlane.xlu1 %1372 }
 0x737   : > { %v1374_v63 = vmul.f32 0.03125, %v1373_v11 }
 0x739   : > { %v1375_v0 = vadd.f32 1e-12, %v1374_v63 }
 0x73b   : > { %1763 = vrsqrt.f32 %v1375_v0 }
 0x745   : > { %v1764_v1 = vpop.eup %1763 }
 0x746   : > { %v1377_v3 = vmul.f32 %v1764_v1, %v1369_v60 }
 0x748   : > { %v1384_v6 = vmul.f32 %v1553_v2, %v1377_v3 }
 0x74a   : > { %v1391_v7 = vadd.f32 %v1554_v4, %v1384_v6 }
 0x74c   : > { %1392 = vst.msk [vmem:[%s399_s27] sm:$0xff] %vm415_vm1, %v1391_v7 }
 0x74d PF: > { %p1689_p5 = scmp.ge.s32.totalorder %s1827_s16, 2  ;;  %s1436_s12 = sand.u32 1, %s1815_s13  }
 0x74e   : > { %s1437_s30 = scalar_lea.sflag [#allocation3], %s1436_s12 }
 0x74f   : > { %p1686_p1 = pnand %p1689_p5, %p1942_p6 }
 0x751   : > { %1810 = dma.done.wait (!%p1686_p1), %s1437_s30, 512  }
 0x752   : > { %1812 = vsyncadd (!%p1686_p1), %s1437_s30, 4294966784  ;;  %p21_p2 = scmp.ge.s32.totalorder %s1925_s19, 4   ;;  %s2184_s13 = smov %s1819_s14 }
 0x753   : > { %s2185_s14 = smov %s1823_s15  ;;  %s2186_s15 = smov %s1936_s22 }
 0x754   : > { %s2187_s16 = smov %s1925_s19  ;;  %23 = sbr.rel (!%p21_p2) target bundleno = 3 (0x3), region = 112 }
 0x75b   :  { %1442 = vsyncpa [#allocation3], 1 }
 0x75c   :  { %1444 = vsyncpa [#allocation3 + $0x1], 1 }

</bundles_post_ra>
